<compile_context>
chip_gen: v7x
topology: tpu7x:2x2x1
jax: 0.10.0
libtpu: 0.0.40
codegen_flags: <defaults>
</compile_context>

<pallas_src>
import jax
import jax.numpy as jnp
from jax.experimental import pallas as pl
from jax.experimental.pallas import tpu as pltpu

CP = 128  # lane-padded channel width for the embedding dim and every conv layer


def _pad_lanes(x, width=CP):
    return jnp.pad(x, [(0, 0)] * (x.ndim - 1) + [(0, width - x.shape[-1])])


def _im2col_weight(w, cin_p=CP, cout_p=CP):
    # w: (3, Cin, Cout) with w[k] = torch conv weight[:, :, k].T  ->  (3*cin_p, cout_p)
    k, cin, cout = w.shape
    wp = jnp.zeros((k, cin_p, cout_p), jnp.float32).at[:, :cin, :cout].set(w)
    return wp.reshape(k * cin_p, cout_p)


def sentiment_cnn_forward(text, table, w1, b1, w2, b2, w3, b3, wfc, bfc):
    """text: (B, L) int token ids. Returns sigmoid probabilities, shape (B,)."""
    B, L = text.shape
    V = table.shape[0]
    assert B <= CP, "all B outputs are packed into one 128-lane output row"
    L1 = L - 2                                              # conv1 output length

    # Wrapper-side layout plumbing: lane-pad channels to 128, im2col the conv
    # weights, and stack the batch's token ids into one (B*L, 1) column.
    text_col = text.astype(jnp.int32).reshape(B * L, 1)
    table_p = _pad_lanes(table).astype(jnp.float32)          # (V, CP)
    w1p, w2p, w3p = (_im2col_weight(w) for w in (w1, w2, w3))  # (3*CP, CP)
    b1p, b2p, b3p = (_pad_lanes(b) for b in (b1, b2, b3))    # (1, CP)
    wfcp = _pad_lanes(wfc)                                   # (Lp3, CP)
    bfcp = bfc.astype(jnp.float32)                           # (1, 1)

    def kernel(text_ref, table_ref, w1_ref, b1_ref, w2_ref, b2_ref,
               w3_ref, b3_ref, wfc_ref, bfc_ref, out_ref, s_ref):
        # --- Embedding gather as ONE batched one-hot MXU matmul --------------
        # (B*L, V) @ (V, CP) -> (B*L, CP); one-hot is cast exactly once.
        # TODO(synk): for a real vocabulary keep the table in HBM
        # (memory_space=pl.ANY) and DMA-gather rows via scalar-prefetched token
        # ids instead of materializing the one-hot (critical on v7x's 64 MiB VMEM).
        tok = text_ref[...]                                           # (B*L, 1)
        iota_v = jax.lax.broadcasted_iota(jnp.int32, (B * L, V), 1)
        onehot = (iota_v == tok).astype(jnp.float32)
        x_all = jnp.dot(onehot, table_ref[...],
                        preferred_element_type=jnp.float32)           # (B*L, CP)
        xs = [x_all[b * L:(b + 1) * L, :] for b in range(B)]          # per-batch views

        def conv_relu_pool(xs, w_ref, b_ref):
            # Conv1d(kernel=3, stride=1, no pad) for the WHOLE batch as a single
            # im2col matmul: (B*Lout, 3*CP) @ (3*CP, CP); bias + ReLU, then
            # MaxPool1d(2) as two stride-2 sublane loads from a VMEM stage.
            Lcur = xs[0].shape[0]
            Lout = Lcur - 2
            Lp = Lout // 2
            xi = jnp.concatenate(
                [jnp.concatenate([xb[0:Lout, :], xb[1:Lout + 1, :],
                                  xb[2:Lout + 2, :]], axis=1)
                 for xb in xs], axis=0)                               # (B*Lout, 3CP)
            acc = jnp.dot(xi, w_ref[...],
                          preferred_element_type=jnp.float32)         # (B*Lout, CP)
            acc = jnp.maximum(acc + b_ref[...], 0.0)                  # bias + ReLU
            s_ref[0:B * Lout, :] = acc                                # lane-dense stage
            return [jnp.maximum(s_ref[pl.ds(b * Lout, Lp, stride=2), :],
                                s_ref[pl.ds(b * Lout + 1, Lp, stride=2), :])
                    for b in range(B)]                                # B x (Lp, CP)

        hs = conv_relu_pool(xs, w1_ref, b1_ref)
        hs = conv_relu_pool(hs, w2_ref, b2_ref)
        hs = conv_relu_pool(hs, w3_ref, b3_ref)                       # B x (Lp3, CP)

        # fc(x.view(B, -1)) + sigmoid: wfc is pre-rearranged/padded to (Lp3, CP)
        # so the torch channel-major flatten reduces to elementwise mul + sum.
        # All B probabilities land in ONE lane-dense (1, 128) row; lanes >= B
        # are zero padding (the wrapper slices them off).
        lane = jax.lax.broadcasted_iota(jnp.int32, (1, CP), 1)
        row = jnp.zeros((1, CP), jnp.float32)
        for b in range(B):
            logit = jnp.sum(hs[b] * wfc_ref[...], keepdims=True) + bfc_ref[...]
            prob = jax.nn.sigmoid(logit)                              # (1, 1)
            row = jnp.where(lane == b, jnp.broadcast_to(prob, (1, CP)), row)
        out_ref[...] = row                                            # single store

    operands = (text_col, table_p, w1p, b1p, w2p, b2p, w3p, b3p, wfcp, bfcp)

    def full(a):  # whole-array operand, constant block index
        return pl.BlockSpec(a.shape, lambda i, _n=a.ndim: (0,) * _n)

    # Advisory cost hint: this kernel is launch/latency bound on every TPU
    # generation; the hint lets XLA overlap surrounding ops around the call.
    Lp1 = L1 // 2
    L2o, Lp2 = Lp1 - 2, (Lp1 - 2) // 2
    L3o, Lp3 = Lp2 - 2, (Lp2 - 2) // 2
    flops = 2 * B * (L * V * CP + (L1 + L2o + L3o) * 3 * CP * CP + Lp3 * CP)
    bytes_accessed = sum(int(a.size) * a.dtype.itemsize for a in operands) + CP * 4
    cost = pl.CostEstimate(flops=flops, transcendentals=B,
                           bytes_accessed=bytes_accessed)

    out = pl.pallas_call(
        kernel,
        out_shape=jax.ShapeDtypeStruct((1, CP), jnp.float32),
        grid=(1,),                                     # whole batch in one step
        in_specs=[full(a) for a in operands],
        out_specs=pl.BlockSpec((1, CP), lambda i: (0, 0)),
        scratch_shapes=[pltpu.VMEM((B * L1, CP), jnp.float32)],  # shared ReLU stage
        compiler_params=pltpu.CompilerParams(
            dimension_semantics=("arbitrary",)),       # single step, single core
        cost_estimate=cost,
    )(*operands)
    return out[0, :B]                                  # .squeeze(-1); drop lane padding


def reference_forward(text, table, w1, b1, w2, b2, w3, b3, wfc, bfc):
    """Pure-JAX f32 reference following the PyTorch NCL conventions."""
    emb = jnp.take(table, text, axis=0)                      # (B, L, E)
    x = jnp.transpose(emb, (0, 2, 1))                        # (B, E, L)

    def conv_relu_pool(x, w, b):                             # w: (K, Cin, Cout)
        K = w.shape[0]
        Lout = x.shape[2] - (K - 1)
        y = jnp.zeros((x.shape[0], w.shape[2], Lout), jnp.float32)
        for k in range(K):
            # torch conv1d: y[b,o,t] += sum_c weight[o,c,k] * x[b,c,t+k]
            y = y + jnp.einsum('bcl,co->bol', x[:, :, k:k + Lout], w[k],
                               preferred_element_type=jnp.float32)
        y = jnp.maximum(y + b[0][None, :, None], 0.0)
        Lp = Lout // 2
        return jnp.maximum(y[:, :, 0:2 * Lp:2], y[:, :, 1:2 * Lp:2])

    x = conv_relu_pool(x, w1, b1)
    x = conv_relu_pool(x, w2, b2)
    x = conv_relu_pool(x, w3, b3)                            # (B, C3, Lp3)
    flat = x.reshape(x.shape[0], -1)                         # torch .view(B, -1)
    fc_w = jnp.transpose(wfc, (1, 0)).reshape(-1)            # torch flatten order
    logits = jnp.sum(flat * fc_w[None, :], axis=1) + bfc[0, 0]
    return jax.nn.sigmoid(logits)                            # (B,)


if __name__ == "__main__":
    # Small shapes consistent with the module: vocab=128, embedding_dim=32,
    # hidden_dim=48 (-> conv channels 16/24/48), batch=2, seq_len=64.
    B, L, V, E, H = 2, 64, 128, 32, 48
    C1, C2, C3 = H // 3, H // 2, H
    Lp3 = (((L - 2) // 2 - 2) // 2 - 2) // 2                 # = 6
    flat_size = C3 * Lp3                                     # module's "4480" analogue

    key = jax.random.PRNGKey(0)
    ks = jax.random.split(key, 6)

    table = jax.random.uniform(ks[0], (V, E), jnp.float32, -0.1, 0.1)

    def kaiming_uniform(k, shape, fan_in):
        bound = (6.0 / fan_in) ** 0.5
        return jax.random.uniform(k, shape, jnp.float32, -bound, bound)

    # w[k] is the (Cin, Cout) slice of the torch conv weight at tap k.
    w1 = kaiming_uniform(ks[1], (3, E, C1), 3 * E)
    w2 = kaiming_uniform(ks[2], (3, C1, C2), 3 * C1)
    w3 = kaiming_uniform(ks[3], (3, C2, C3), 3 * C2)
    b1 = jnp.zeros((1, C1), jnp.float32)
    b2 = jnp.zeros((1, C2), jnp.float32)
    b3 = jnp.zeros((1, C3), jnp.float32)

    fc_bound = (6.0 / (flat_size + 1)) ** 0.5
    # wfc[t, c] corresponds to torch fc.weight[0, c*Lp3 + t]
    wfc = jax.random.uniform(ks[4], (Lp3, C3), jnp.float32, -fc_bound, fc_bound)
    bfc = jnp.zeros((1, 1), jnp.float32)

    text = jax.random.randint(ks[5], (B, L), 0, V, dtype=jnp.int32)

    out = sentiment_cnn_forward(text, table, w1, b1, w2, b2, w3, b3, wfc, bfc)
    out = jax.block_until_ready(out)

    ref = reference_forward(text, table, w1, b1, w2, b2, w3, b3, wfc, bfc)
    ref = jax.block_until_ready(ref)

    assert out.shape == (B,)
    assert jnp.allclose(out, ref, atol=1e-3, rtol=1e-3), (out, ref)
    print("KERNEL_OK")
</pallas_src>

<mosaic_0001>
module attributes {stable_mosaic.version = 11 : i64} {
  func.func @kernel(%arg0: i32, %arg1: memref<128x1xi32, #tpu.memory_space<vmem>>, %arg2: memref<128x128xf32, #tpu.memory_space<vmem>>, %arg3: memref<384x128xf32, #tpu.memory_space<vmem>>, %arg4: memref<1x128xf32, #tpu.memory_space<vmem>>, %arg5: memref<384x128xf32, #tpu.memory_space<vmem>>, %arg6: memref<1x128xf32, #tpu.memory_space<vmem>>, %arg7: memref<384x128xf32, #tpu.memory_space<vmem>>, %arg8: memref<1x128xf32, #tpu.memory_space<vmem>>, %arg9: memref<6x128xf32, #tpu.memory_space<vmem>>, %arg10: memref<1x1xf32, #tpu.memory_space<vmem>>, %arg11: memref<1x128xf32, #tpu.memory_space<vmem>>, %arg12: memref<124x128xf32, #tpu.memory_space<vmem>>) attributes {dimension_semantics = [#tpu.dimension_semantics<arbitrary>], iteration_bounds = array<i64: 1>, scalar_prefetch = 0 : i64, scratch_operands = 1 : i64, tpu.core_type = #tpu.core_type<tc>, window_params = [{pipeline_mode = #tpu.pipeline_mode<synchronous>, transform_indices = @transform_0, window_bounds = array<i64: 128, 1>}, {pipeline_mode = #tpu.pipeline_mode<synchronous>, transform_indices = @transform_1, window_bounds = array<i64: 128, 128>}, {pipeline_mode = #tpu.pipeline_mode<synchronous>, transform_indices = @transform_2, window_bounds = array<i64: 384, 128>}, {pipeline_mode = #tpu.pipeline_mode<synchronous>, transform_indices = @transform_3, window_bounds = array<i64: 1, 128>}, {pipeline_mode = #tpu.pipeline_mode<synchronous>, transform_indices = @transform_4, window_bounds = array<i64: 384, 128>}, {pipeline_mode = #tpu.pipeline_mode<synchronous>, transform_indices = @transform_5, window_bounds = array<i64: 1, 128>}, {pipeline_mode = #tpu.pipeline_mode<synchronous>, transform_indices = @transform_6, window_bounds = array<i64: 384, 128>}, {pipeline_mode = #tpu.pipeline_mode<synchronous>, transform_indices = @transform_7, window_bounds = array<i64: 1, 128>}, {pipeline_mode = #tpu.pipeline_mode<synchronous>, transform_indices = @transform_8, window_bounds = array<i64: 6, 128>}, {pipeline_mode = #tpu.pipeline_mode<synchronous>, transform_indices = @transform_9, window_bounds = array<i64: 1, 1>}, {pipeline_mode = #tpu.pipeline_mode<synchronous>, transform_indices = @transform_10, window_bounds = array<i64: 1, 128>}]} {
    %c0 = arith.constant 0 : index
    %c0_0 = arith.constant 0 : index
    %0 = vector.load %arg1[%c0, %c0_0] : memref<128x1xi32, #tpu.memory_space<vmem>>, vector<128x1xi32>
    %1 = tpu.iota {dimensions = array<i32: 1>} : vector<128x128xi32>
    %2 = vector.broadcast %0 : vector<128x1xi32> to vector<128x128xi32>
    %3 = arith.cmpi eq, %1, %2 : vector<128x128xi32>
    %4 = arith.extui %3 : vector<128x128xi1> to vector<128x128xi32>
    %5 = arith.sitofp %4 : vector<128x128xi32> to vector<128x128xf32>
    %c0_1 = arith.constant 0 : index
    %c0_2 = arith.constant 0 : index
    %6 = vector.load %arg2[%c0_1, %c0_2] : memref<128x128xf32, #tpu.memory_space<vmem>>, vector<128x128xf32>
    %cst = arith.constant dense<0.000000e+00> : vector<128x128xf32>
    %7 = tpu.matmul %5, %6, %cst {dimension_numbers = #tpu.dot_dimension_numbers<[1], [0], [0], [1], [0, 0, 1, 1], [], []>} : vector<128x128xf32>, vector<128x128xf32>, vector<128x128xf32> -> vector<128x128xf32>
    %8 = vector.extract_strided_slice %7 {offsets = [0, 0], sizes = [64, 128], strides = [1, 1]} : vector<128x128xf32> to vector<64x128xf32>
    %9 = vector.extract_strided_slice %7 {offsets = [64, 0], sizes = [64, 128], strides = [1, 1]} : vector<128x128xf32> to vector<64x128xf32>
    %10 = vector.extract_strided_slice %8 {offsets = [0, 0], sizes = [62, 128], strides = [1, 1]} : vector<64x128xf32> to vector<62x128xf32>
    %11 = vector.extract_strided_slice %8 {offsets = [1, 0], sizes = [62, 128], strides = [1, 1]} : vector<64x128xf32> to vector<62x128xf32>
    %12 = vector.extract_strided_slice %8 {offsets = [2, 0], sizes = [62, 128], strides = [1, 1]} : vector<64x128xf32> to vector<62x128xf32>
    %13 = tpu.concatenate %10, %11, %12 in 1 : vector<62x128xf32>, vector<62x128xf32>, vector<62x128xf32> -> vector<62x384xf32>
    %14 = vector.extract_strided_slice %9 {offsets = [0, 0], sizes = [62, 128], strides = [1, 1]} : vector<64x128xf32> to vector<62x128xf32>
    %15 = vector.extract_strided_slice %9 {offsets = [1, 0], sizes = [62, 128], strides = [1, 1]} : vector<64x128xf32> to vector<62x128xf32>
    %16 = vector.extract_strided_slice %9 {offsets = [2, 0], sizes = [62, 128], strides = [1, 1]} : vector<64x128xf32> to vector<62x128xf32>
    %17 = tpu.concatenate %14, %15, %16 in 1 : vector<62x128xf32>, vector<62x128xf32>, vector<62x128xf32> -> vector<62x384xf32>
    %18 = tpu.concatenate %13, %17 in 0 : vector<62x384xf32>, vector<62x384xf32> -> vector<124x384xf32>
    %c0_3 = arith.constant 0 : index
    %c0_4 = arith.constant 0 : index
    %19 = vector.load %arg3[%c0_3, %c0_4] : memref<384x128xf32, #tpu.memory_space<vmem>>, vector<384x128xf32>
    %cst_5 = arith.constant dense<0.000000e+00> : vector<124x128xf32>
    %20 = tpu.matmul %18, %19, %cst_5 {dimension_numbers = #tpu.dot_dimension_numbers<[1], [0], [0], [1], [0, 0, 1, 1], [], []>} : vector<124x384xf32>, vector<384x128xf32>, vector<124x128xf32> -> vector<124x128xf32>
    %c0_6 = arith.constant 0 : index
    %c0_7 = arith.constant 0 : index
    %21 = vector.load %arg4[%c0_6, %c0_7] : memref<1x128xf32, #tpu.memory_space<vmem>>, vector<1x128xf32>
    %22 = vector.broadcast %21 : vector<1x128xf32> to vector<124x128xf32>
    %23 = arith.addf %20, %22 : vector<124x128xf32>
    %cst_8 = arith.constant 0.000000e+00 : f32
    %24 = vector.broadcast %cst_8 : f32 to vector<124x128xf32>
    %25 = arith.maximumf %23, %24 : vector<124x128xf32>
    %c0_9 = arith.constant 0 : index
    %c0_10 = arith.constant 0 : index
    %26 = vector.load %arg12[%c0_9, %c0_10] : memref<124x128xf32, #tpu.memory_space<vmem>>, vector<124x128xf32>
    tpu.vector_store %arg12[%c0_9, %c0_10], %25 {strides = array<i32>} : memref<124x128xf32, #tpu.memory_space<vmem>>, vector<124x128xf32>,
    %c0_11 = arith.constant 0 : index
    %c0_12 = arith.constant 0 : index
    %27 = tpu.strided_load %arg12[%c0_11, %c0_12] {strides = array<i32: 2, 1>} : memref<124x128xf32, #tpu.memory_space<vmem>>, vector<31x128xf32>
    %c1 = arith.constant 1 : index
    %c0_13 = arith.constant 0 : index
    %28 = tpu.strided_load %arg12[%c1, %c0_13] {strides = array<i32: 2, 1>} : memref<124x128xf32, #tpu.memory_space<vmem>>, vector<31x128xf32>
    %29 = arith.maximumf %27, %28 : vector<31x128xf32>
    %c62 = arith.constant 62 : index
    %c0_14 = arith.constant 0 : index
    %30 = tpu.strided_load %arg12[%c62, %c0_14] {strides = array<i32: 2, 1>} : memref<124x128xf32, #tpu.memory_space<vmem>>, vector<31x128xf32>
    %c63 = arith.constant 63 : index
    %c0_15 = arith.constant 0 : index
    %31 = tpu.strided_load %arg12[%c63, %c0_15] {strides = array<i32: 2, 1>} : memref<124x128xf32, #tpu.memory_space<vmem>>, vector<31x128xf32>
    %32 = arith.maximumf %30, %31 : vector<31x128xf32>
    %33 = vector.extract_strided_slice %29 {offsets = [0, 0], sizes = [29, 128], strides = [1, 1]} : vector<31x128xf32> to vector<29x128xf32>
    %34 = vector.extract_strided_slice %29 {offsets = [1, 0], sizes = [29, 128], strides = [1, 1]} : vector<31x128xf32> to vector<29x128xf32>
    %35 = vector.extract_strided_slice %29 {offsets = [2, 0], sizes = [29, 128], strides = [1, 1]} : vector<31x128xf32> to vector<29x128xf32>
    %36 = tpu.concatenate %33, %34, %35 in 1 : vector<29x128xf32>, vector<29x128xf32>, vector<29x128xf32> -> vector<29x384xf32>
    %37 = vector.extract_strided_slice %32 {offsets = [0, 0], sizes = [29, 128], strides = [1, 1]} : vector<31x128xf32> to vector<29x128xf32>
    %38 = vector.extract_strided_slice %32 {offsets = [1, 0], sizes = [29, 128], strides = [1, 1]} : vector<31x128xf32> to vector<29x128xf32>
    %39 = vector.extract_strided_slice %32 {offsets = [2, 0], sizes = [29, 128], strides = [1, 1]} : vector<31x128xf32> to vector<29x128xf32>
    %40 = tpu.concatenate %37, %38, %39 in 1 : vector<29x128xf32>, vector<29x128xf32>, vector<29x128xf32> -> vector<29x384xf32>
    %41 = tpu.concatenate %36, %40 in 0 : vector<29x384xf32>, vector<29x384xf32> -> vector<58x384xf32>
    %c0_16 = arith.constant 0 : index
    %c0_17 = arith.constant 0 : index
    %42 = vector.load %arg5[%c0_16, %c0_17] : memref<384x128xf32, #tpu.memory_space<vmem>>, vector<384x128xf32>
    %cst_18 = arith.constant dense<0.000000e+00> : vector<58x128xf32>
    %43 = tpu.matmul %41, %42, %cst_18 {dimension_numbers = #tpu.dot_dimension_numbers<[1], [0], [0], [1], [0, 0, 1, 1], [], []>} : vector<58x384xf32>, vector<384x128xf32>, vector<58x128xf32> -> vector<58x128xf32>
    %c0_19 = arith.constant 0 : index
    %c0_20 = arith.constant 0 : index
    %44 = vector.load %arg6[%c0_19, %c0_20] : memref<1x128xf32, #tpu.memory_space<vmem>>, vector<1x128xf32>
    %45 = vector.broadcast %44 : vector<1x128xf32> to vector<58x128xf32>
    %46 = arith.addf %43, %45 : vector<58x128xf32>
    %cst_21 = arith.constant 0.000000e+00 : f32
    %47 = vector.broadcast %cst_21 : f32 to vector<58x128xf32>
    %48 = arith.maximumf %46, %47 : vector<58x128xf32>
    %c0_22 = arith.constant 0 : index
    %c0_23 = arith.constant 0 : index
    %49 = vector.load %arg12[%c0_22, %c0_23] : memref<124x128xf32, #tpu.memory_space<vmem>>, vector<58x128xf32>
    tpu.vector_store %arg12[%c0_22, %c0_23], %48 {strides = array<i32>} : memref<124x128xf32, #tpu.memory_space<vmem>>, vector<58x128xf32>,
    %c0_24 = arith.constant 0 : index
    %c0_25 = arith.constant 0 : index
    %50 = tpu.strided_load %arg12[%c0_24, %c0_25] {strides = array<i32: 2, 1>} : memref<124x128xf32, #tpu.memory_space<vmem>>, vector<14x128xf32>
    %c1_26 = arith.constant 1 : index
    %c0_27 = arith.constant 0 : index
    %51 = tpu.strided_load %arg12[%c1_26, %c0_27] {strides = array<i32: 2, 1>} : memref<124x128xf32, #tpu.memory_space<vmem>>, vector<14x128xf32>
    %52 = arith.maximumf %50, %51 : vector<14x128xf32>
    %c29 = arith.constant 29 : index
    %c0_28 = arith.constant 0 : index
    %53 = tpu.strided_load %arg12[%c29, %c0_28] {strides = array<i32: 2, 1>} : memref<124x128xf32, #tpu.memory_space<vmem>>, vector<14x128xf32>
    %c30 = arith.constant 30 : index
    %c0_29 = arith.constant 0 : index
    %54 = tpu.strided_load %arg12[%c30, %c0_29] {strides = array<i32: 2, 1>} : memref<124x128xf32, #tpu.memory_space<vmem>>, vector<14x128xf32>
    %55 = arith.maximumf %53, %54 : vector<14x128xf32>
    %56 = vector.extract_strided_slice %52 {offsets = [0, 0], sizes = [12, 128], strides = [1, 1]} : vector<14x128xf32> to vector<12x128xf32>
    %57 = vector.extract_strided_slice %52 {offsets = [1, 0], sizes = [12, 128], strides = [1, 1]} : vector<14x128xf32> to vector<12x128xf32>
    %58 = vector.extract_strided_slice %52 {offsets = [2, 0], sizes = [12, 128], strides = [1, 1]} : vector<14x128xf32> to vector<12x128xf32>
    %59 = tpu.concatenate %56, %57, %58 in 1 : vector<12x128xf32>, vector<12x128xf32>, vector<12x128xf32> -> vector<12x384xf32>
    %60 = vector.extract_strided_slice %55 {offsets = [0, 0], sizes = [12, 128], strides = [1, 1]} : vector<14x128xf32> to vector<12x128xf32>
    %61 = vector.extract_strided_slice %55 {offsets = [1, 0], sizes = [12, 128], strides = [1, 1]} : vector<14x128xf32> to vector<12x128xf32>
    %62 = vector.extract_strided_slice %55 {offsets = [2, 0], sizes = [12, 128], strides = [1, 1]} : vector<14x128xf32> to vector<12x128xf32>
    %63 = tpu.concatenate %60, %61, %62 in 1 : vector<12x128xf32>, vector<12x128xf32>, vector<12x128xf32> -> vector<12x384xf32>
    %64 = tpu.concatenate %59, %63 in 0 : vector<12x384xf32>, vector<12x384xf32> -> vector<24x384xf32>
    %c0_30 = arith.constant 0 : index
    %c0_31 = arith.constant 0 : index
    %65 = vector.load %arg7[%c0_30, %c0_31] : memref<384x128xf32, #tpu.memory_space<vmem>>, vector<384x128xf32>
    %cst_32 = arith.constant dense<0.000000e+00> : vector<24x128xf32>
    %66 = tpu.matmul %64, %65, %cst_32 {dimension_numbers = #tpu.dot_dimension_numbers<[1], [0], [0], [1], [0, 0, 1, 1], [], []>} : vector<24x384xf32>, vector<384x128xf32>, vector<24x128xf32> -> vector<24x128xf32>
    %c0_33 = arith.constant 0 : index
    %c0_34 = arith.constant 0 : index
    %67 = vector.load %arg8[%c0_33, %c0_34] : memref<1x128xf32, #tpu.memory_space<vmem>>, vector<1x128xf32>
    %68 = vector.broadcast %67 : vector<1x128xf32> to vector<24x128xf32>
    %69 = arith.addf %66, %68 : vector<24x128xf32>
    %cst_35 = arith.constant 0.000000e+00 : f32
    %70 = vector.broadcast %cst_35 : f32 to vector<24x128xf32>
    %71 = arith.maximumf %69, %70 : vector<24x128xf32>
    %c0_36 = arith.constant 0 : index
    %c0_37 = arith.constant 0 : index
    %72 = vector.load %arg12[%c0_36, %c0_37] : memref<124x128xf32, #tpu.memory_space<vmem>>, vector<24x128xf32>
    tpu.vector_store %arg12[%c0_36, %c0_37], %71 {strides = array<i32>} : memref<124x128xf32, #tpu.memory_space<vmem>>, vector<24x128xf32>,
    %c0_38 = arith.constant 0 : index
    %c0_39 = arith.constant 0 : index
    %73 = tpu.strided_load %arg12[%c0_38, %c0_39] {strides = array<i32: 2, 1>} : memref<124x128xf32, #tpu.memory_space<vmem>>, vector<6x128xf32>
    %c1_40 = arith.constant 1 : index
    %c0_41 = arith.constant 0 : index
    %74 = tpu.strided_load %arg12[%c1_40, %c0_41] {strides = array<i32: 2, 1>} : memref<124x128xf32, #tpu.memory_space<vmem>>, vector<6x128xf32>
    %75 = arith.maximumf %73, %74 : vector<6x128xf32>
    %c12 = arith.constant 12 : index
    %c0_42 = arith.constant 0 : index
    %76 = tpu.strided_load %arg12[%c12, %c0_42] {strides = array<i32: 2, 1>} : memref<124x128xf32, #tpu.memory_space<vmem>>, vector<6x128xf32>
    %c13 = arith.constant 13 : index
    %c0_43 = arith.constant 0 : index
    %77 = tpu.strided_load %arg12[%c13, %c0_43] {strides = array<i32: 2, 1>} : memref<124x128xf32, #tpu.memory_space<vmem>>, vector<6x128xf32>
    %78 = arith.maximumf %76, %77 : vector<6x128xf32>
    %79 = tpu.iota {dimensions = array<i32: 1>} : vector<1x128xi32>
    %cst_44 = arith.constant 0.000000e+00 : f32
    %80 = vector.broadcast %cst_44 : f32 to vector<1x128xf32>
    %c0_45 = arith.constant 0 : index
    %c0_46 = arith.constant 0 : index
    %81 = vector.load %arg9[%c0_45, %c0_46] : memref<6x128xf32, #tpu.memory_space<vmem>>, vector<6x128xf32>
    %82 = arith.mulf %75, %81 : vector<6x128xf32>
    %83 = vector.shape_cast %82 : vector<6x128xf32> to vector<1x6x128xf32>
    %cst_47 = arith.constant dense<0.000000e+00> : vector<1xf32>
    %84 = vector.multi_reduction <add>, %83, %cst_47 [1, 2] : vector<1x6x128xf32> to vector<1xf32>
    %85 = vector.shape_cast %84 : vector<1xf32> to vector<1x1x1xf32>
    %86 = vector.extract %85[0, 0, 0] : f32 from vector<1x1x1xf32>
    %87 = vector.broadcast %86 : f32 to vector<1x1xf32>
    %c0_48 = arith.constant 0 : index
    %c0_49 = arith.constant 0 : index
    %88 = vector.load %arg10[%c0_48, %c0_49] : memref<1x1xf32, #tpu.memory_space<vmem>>, vector<1x1xf32>
    %89 = arith.addf %87, %88 : vector<1x1xf32>
    %90 = arith.negf %89 : vector<1x1xf32>
    %91 = math.exp %90 : vector<1x1xf32>
    %cst_50 = arith.constant 1.000000e+00 : f32
    %92 = vector.broadcast %cst_50 : f32 to vector<1x1xf32>
    %93 = arith.addf %92, %91 : vector<1x1xf32>
    %94 = arith.divf %92, %93 : vector<1x1xf32>
    %c0_i32 = arith.constant 0 : i32
    %95 = vector.broadcast %c0_i32 : i32 to vector<1x128xi32>
    %96 = arith.cmpi eq, %79, %95 : vector<1x128xi32>
    %97 = vector.shape_cast %94 : vector<1x1xf32> to vector<1x1xf32>
    %98 = vector.broadcast %97 : vector<1x1xf32> to vector<1x128xf32>
    %99 = arith.select %96, %98, %80 : vector<1x128xi1>, vector<1x128xf32>
    %c0_51 = arith.constant 0 : index
    %c0_52 = arith.constant 0 : index
    %100 = vector.load %arg9[%c0_51, %c0_52] : memref<6x128xf32, #tpu.memory_space<vmem>>, vector<6x128xf32>
    %101 = arith.mulf %78, %100 : vector<6x128xf32>
    %102 = vector.shape_cast %101 : vector<6x128xf32> to vector<1x6x128xf32>
    %cst_53 = arith.constant dense<0.000000e+00> : vector<1xf32>
    %103 = vector.multi_reduction <add>, %102, %cst_53 [1, 2] : vector<1x6x128xf32> to vector<1xf32>
    %104 = vector.shape_cast %103 : vector<1xf32> to vector<1x1x1xf32>
    %105 = vector.extract %104[0, 0, 0] : f32 from vector<1x1x1xf32>
    %106 = vector.broadcast %105 : f32 to vector<1x1xf32>
    %c0_54 = arith.constant 0 : index
    %c0_55 = arith.constant 0 : index
    %107 = vector.load %arg10[%c0_54, %c0_55] : memref<1x1xf32, #tpu.memory_space<vmem>>, vector<1x1xf32>
    %108 = arith.addf %106, %107 : vector<1x1xf32>
    %109 = arith.negf %108 : vector<1x1xf32>
    %110 = math.exp %109 : vector<1x1xf32>
    %cst_56 = arith.constant 1.000000e+00 : f32
    %111 = vector.broadcast %cst_56 : f32 to vector<1x1xf32>
    %112 = arith.addf %111, %110 : vector<1x1xf32>
    %113 = arith.divf %111, %112 : vector<1x1xf32>
    %c1_i32 = arith.constant 1 : i32
    %114 = vector.broadcast %c1_i32 : i32 to vector<1x128xi32>
    %115 = arith.cmpi eq, %79, %114 : vector<1x128xi32>
    %116 = vector.shape_cast %113 : vector<1x1xf32> to vector<1x1xf32>
    %117 = vector.broadcast %116 : vector<1x1xf32> to vector<1x128xf32>
    %118 = arith.select %115, %117, %99 : vector<1x128xi1>, vector<1x128xf32>
    %c0_57 = arith.constant 0 : index
    %c0_58 = arith.constant 0 : index
    %119 = vector.load %arg11[%c0_57, %c0_58] : memref<1x128xf32, #tpu.memory_space<vmem>>, vector<1x128xf32>
    tpu.vector_store %arg11[%c0_57, %c0_58], %118 {strides = array<i32>} : memref<1x128xf32, #tpu.memory_space<vmem>>, vector<1x128xf32>,
    return
  }
  func.func @transform_0(%arg0: i32) -> (i32, i32) {
    %c0_i32 = arith.constant 0 : i32
    %c0_i32_0 = arith.constant 0 : i32
    %c0_i32_1 = arith.constant 0 : i32
    return %c0_i32, %c0_i32_0 : i32, i32
  }
  func.func @transform_1(%arg0: i32) -> (i32, i32) {
    %c0_i32 = arith.constant 0 : i32
    %c0_i32_0 = arith.constant 0 : i32
    %c0_i32_1 = arith.constant 0 : i32
    return %c0_i32, %c0_i32_0 : i32, i32
  }
  func.func @transform_2(%arg0: i32) -> (i32, i32) {
    %c0_i32 = arith.constant 0 : i32
    %c0_i32_0 = arith.constant 0 : i32
    %c0_i32_1 = arith.constant 0 : i32
    return %c0_i32, %c0_i32_0 : i32, i32
  }
  func.func @transform_3(%arg0: i32) -> (i32, i32) {
    %c0_i32 = arith.constant 0 : i32
    %c0_i32_0 = arith.constant 0 : i32
    %c0_i32_1 = arith.constant 0 : i32
    return %c0_i32, %c0_i32_0 : i32, i32
  }
  func.func @transform_4(%arg0: i32) -> (i32, i32) {
    %c0_i32 = arith.constant 0 : i32
    %c0_i32_0 = arith.constant 0 : i32
    %c0_i32_1 = arith.constant 0 : i32
    return %c0_i32, %c0_i32_0 : i32, i32
  }
  func.func @transform_5(%arg0: i32) -> (i32, i32) {
    %c0_i32 = arith.constant 0 : i32
    %c0_i32_0 = arith.constant 0 : i32
    %c0_i32_1 = arith.constant 0 : i32
    return %c0_i32, %c0_i32_0 : i32, i32
  }
  func.func @transform_6(%arg0: i32) -> (i32, i32) {
    %c0_i32 = arith.constant 0 : i32
    %c0_i32_0 = arith.constant 0 : i32
    %c0_i32_1 = arith.constant 0 : i32
    return %c0_i32, %c0_i32_0 : i32, i32
  }
  func.func @transform_7(%arg0: i32) -> (i32, i32) {
    %c0_i32 = arith.constant 0 : i32
    %c0_i32_0 = arith.constant 0 : i32
    %c0_i32_1 = arith.constant 0 : i32
    return %c0_i32, %c0_i32_0 : i32, i32
  }
  func.func @transform_8(%arg0: i32) -> (i32, i32) {
    %c0_i32 = arith.constant 0 : i32
    %c0_i32_0 = arith.constant 0 : i32
    %c0_i32_1 = arith.constant 0 : i32
    return %c0_i32, %c0_i32_0 : i32, i32
  }
  func.func @transform_9(%arg0: i32) -> (i32, i32) {
    %c0_i32 = arith.constant 0 : i32
    %c0_i32_0 = arith.constant 0 : i32
    %c0_i32_1 = arith.constant 0 : i32
    return %c0_i32, %c0_i32_0 : i32, i32
  }
  func.func @transform_10(%arg0: i32) -> (i32, i32) {
    %c0_i32 = arith.constant 0 : i32
    %c0_i32_0 = arith.constant 0 : i32
    %c0_i32_1 = arith.constant 0 : i32
    return %c0_i32, %c0_i32_0 : i32, i32
  }
}

</mosaic_0001>

<bundles_post_ra>
// kernel: tpu_custom_call.1
= control target key start
LH: loop header
LB: loop body
LE: loop exit
PB: predicated region body
PF: predicated region fallthrough
CT: control target
= control target key end

     0   :  { %s2953_s0 = inlined_call_operand.vmem [shape: s32[128,1], index: 0, kind: input, shape index: {}]   ;;  %s2954_s1 = inlined_call_operand.vmem [shape: f32[128,128], index: 1, kind: input, shape index: {}]   ;;  %s2955_s2 = inlined_call_operand.hbm [shape: f32[384,128], index: 2, kind: input, shape index: {}]   ;;  %s2956_s3 = inlined_call_operand.vmem [shape: f32[1,128], index: 3, kind: input, shape index: {}]   ;;  %s2957_s4 = inlined_call_operand.hbm [shape: f32[384,128], index: 4, kind: input, shape index: {}]   ;;  %s2958_s5 = inlined_call_operand.vmem [shape: f32[1,128], index: 5, kind: input, shape index: {}]   ;;  %s2959_s6 = inlined_call_operand.hbm [shape: f32[384,128], index: 6, kind: input, shape index: {}]   ;;  %s2960_s7 = inlined_call_operand.vmem [shape: f32[1,128], index: 7, kind: input, shape index: {}]   ;;  %s2961_s8 = inlined_call_operand.vmem [shape: f32[6,128], index: 8, kind: input, shape index: {}]   ;;  %s2962_s9 = inlined_call_operand.<no memory space> [shape: f32[1,1], index: 9, kind: input, shape index: {}]   ;;  %s2963_s10 = inlined_call_operand.hbm [shape: f32[1,128], index: 10, kind: output, shape index: {}]  }
   0x1   :  { %v15_v0 = vstv %s2962_s9 }
   0x2   :  { %16 = vst [vmem:[#allocation3] sm:$0x1] %v15_v0 }
   0x3   :  { %17 = vsyncpa [#allocation5], 0 }
   0x4   :  { %18 = vsyncpa [#allocation8], 0 }
   0x5   :  { %19 = vsyncpa [#allocation6], 0  ;;  %s2505_s15 = smov [#allocation7]   ;;  %s2506_s17 = smov [#allocation4]  }
   0x6   :  { %s43_s16 = sshll.u32 %s2505_s15, 4  ;;  %s29_s18 = sshll.u32 %s2506_s17, 4  ;;  %s44_s16 = int_to_ptr.vmem [resolvable:$true] %s43_s16  ;;  %s2574_s18 = int_to_ptr.vmem [resolvable:$true] %s29_s18 }
   0x7   :  { %s2411_s21 = scalar_lea.hbm %s2957_s4, 6144 }
   0x8   :  { %p2412_p0 = scmp.ne.s32.totalorder %s2957_s4, %s2411_s21  ;;  %p2415_p1 = scmp.lt.u32.totalorder %s2411_s21, %s2957_s4 }
   0xa   :  { %p2417_p2 = pnand %p2415_p1, %p2412_p0 }
   0xc   :  { %2420 = shalt.err (!%p2417_p2)
}
   0xd   :  { %s2421_s25 = scalar_lea.vmem %s44_s16, 6144  ;;  %p2426_p4 = scmp.lt.s32.totalorder %s44_s16, %s44_s16 }
   0xe   :  { %p2422_p3 = scmp.ne.s32.totalorder %s44_s16, %s2421_s25  ;;  %p2427_p5 = scmp.lt.s32.totalorder %s2421_s25, %s2421_s25 }
  0x10   :  { %p2428_p6 = por %p2427_p5, %p2426_p4 }
  0x12   :  { %p2429_p7 = pnand %p2428_p6, %p2422_p3 }
  0x14   :  { %2432 = shalt.err (!%p2429_p7)
}
  0x15   :  { %s2507_s26 = smov 128   ;;  %s2508_s27 = smov 8  }
  0x16   :  { %49 = dma.hbm_to_vmem [thread:$0]  %s2957_s4, 6144, %s44_s16, [#allocation8], %s2507_s26, %s2507_s26, %s2508_s27  }
  0x17   :  { %s2433_s12 = scalar_lea.hbm %s2955_s2, 6144 }
  0x18   :  { %p2434_p8 = scmp.ne.s32.totalorder %s2955_s2, %s2433_s12  ;;  %p2437_p9 = scmp.lt.u32.totalorder %s2433_s12, %s2955_s2 }
  0x1a   :  { %p2439_p10 = pnand %p2437_p9, %p2434_p8 }
  0x1c   :  { %2442 = shalt.err (!%p2439_p10)
}
  0x1d   :  { %s2443_s19 = scalar_lea.vmem %s2574_s18, 6144  ;;  %p2448_p12 = scmp.lt.s32.totalorder %s2574_s18, %s2574_s18 }
  0x1e   :  { %p2444_p11 = scmp.ne.s32.totalorder %s2574_s18, %s2443_s19  ;;  %p2449_p13 = scmp.lt.s32.totalorder %s2443_s19, %s2443_s19 }
  0x20   :  { %p2450_p0 = por %p2449_p13, %p2448_p12 }
  0x22   :  { %p2451_p1 = pnand %p2450_p0, %p2444_p11 }
  0x24   :  { %2454 = shalt.err (!%p2451_p1)
}
  0x25   :  { %35 = dma.hbm_to_vmem [thread:$0]  %s2955_s2, 6144, %s2574_s18, [#allocation5], %s2507_s26, %s2507_s26, %s2508_s27  }
  0x26   :  { %s2509_s20 = smov [#allocation9]   ;;  %s2455_s9 = scalar_lea.hbm %s2959_s6, 6144 }
  0x27   :  { %s57_s21 = sshll.u32 %s2509_s20, 4  ;;  %p2456_p2 = scmp.ne.s32.totalorder %s2959_s6, %s2455_s9  ;;  %s58_s21 = int_to_ptr.vmem [resolvable:$true] %s57_s21 }
  0x28   :  { %p2459_p3 = scmp.lt.u32.totalorder %s2455_s9, %s2959_s6 }
  0x2a   :  { %p2461_p4 = pnand %p2459_p3, %p2456_p2 }
  0x2c   :  { %2464 = shalt.err (!%p2461_p4)
}
  0x2d   :  { %s2465_s30 = scalar_lea.vmem %s58_s21, 6144  ;;  %p2470_p6 = scmp.lt.s32.totalorder %s58_s21, %s58_s21 }
  0x2e   :  { %p2466_p5 = scmp.ne.s32.totalorder %s58_s21, %s2465_s30  ;;  %p2471_p7 = scmp.lt.s32.totalorder %s2465_s30, %s2465_s30 }
  0x30   :  { %p2472_p8 = por %p2471_p7, %p2470_p6 }
  0x32   :  { %p2473_p9 = pnand %p2472_p8, %p2466_p5 }
  0x34   :  { %2476 = shalt.err (!%p2473_p9)
}
  0x35   :  { %63 = dma.hbm_to_vmem [thread:$0]  %s2959_s6, 6144, %s58_s21, [#allocation8], %s2507_s26, %s2507_s26, %s2508_s27  }
  0x36   :  { %2499 = dma.done.wait [#allocation5], 6144  }
  0x37   :  { %2500 = vsyncadd [#allocation5], 4294961152 }
  0x38   :  { %2501 = dma.done.wait [#allocation8], 12288  }
  0x39   :  { %2502 = vsyncadd [#allocation8], 4294955008  ;;  %v2510_v1 = vmov 0   ;;  %v81_v2 = vld [vmem:[%s2953_s0 + $0x10] sm:$0xff]  ;;  %v79_v3 = vld [vmem:[%s2953_s0] sm:$0xff]  ;;  %s2515_s29 = smov [#allocation10]  }
  0x3a   :  { %2402 = vset.pattern.permute.xlu1 %v2510_v1  ;;  %2401 = vset.pattern.permute.xlu0 %v2510_v1  ;;  %v82_v4 = vld [vmem:[%s2953_s0 + $0x18] sm:$0xff]  ;;  %v80_v5 = vld [vmem:[%s2953_s0 + $0x8] sm:$0xff]  ;;  %v193_v7 = vld [vmem:[%s2954_s1] sm:$0xff]  ;;  %s1642_s30 = sshll.u32 %s2515_s29, 4  ;;  %s1643_s30 = int_to_ptr.vmem [resolvable:$true] %s1642_s30 }
  0x3b   :  { %104 = vperm.xlu1 %2402, %v81_v2   ;;  %98 = vperm.xlu0 %2401, %v79_v3   ;;  %v84_v6 = vld [vmem:[%s2953_s0 + $0x28] sm:$0xff]  ;;  %v83_v9 = vld [vmem:[%s2953_s0 + $0x20] sm:$0xff]  ;;  %v195_v11 = vld [vmem:[%s2954_s1 + $0x10] sm:$0xff]  ;;  %s2477_s2 = scalar_lea.vmem %s1643_s30, 16  ;;  %s2481_s18 = scalar_lea.vmem %s1643_s30, 32 }
  0x3c   :  { %v194_v8 = vld [vmem:[%s2954_s1 + $0x8] sm:$0xff]  ;;  %v196_v12 = vld [vmem:[%s2954_s1 + $0x18] sm:$0xff]  ;;  %v197_v14 = vld [vmem:[%s2954_s1 + $0x20] sm:$0xff]  ;;  %p2478_p10 = scmp.ne.s32.totalorder %s1643_s30, %s2477_s2  ;;  %p2482_p11 = scmp.lt.s32.totalorder %s1643_s30, %s1643_s30 }
  0x3d   :  { %v2170_v10 = vpack.c.bf16 %v194_v8, %v193_v7  ;;  %v2174_v13 = vpack.c.bf16 %v196_v12, %v195_v11  ;;  %v198_v15 = vld [vmem:[%s2954_s1 + $0x28] sm:$0xff]  ;;  %v86_v16 = vld [vmem:[%s2953_s0 + $0x38] sm:$0xff]  ;;  %v85_v17 = vld [vmem:[%s2953_s0 + $0x30] sm:$0xff]  ;;  %p2483_p12 = scmp.lt.s32.totalorder %s2481_s18, %s2477_s2 }
  0x3e   :  { %v2178_v18 = vpack.c.bf16 %v198_v15, %v197_v14  ;;  %v199_v19 = vld [vmem:[%s2954_s1 + $0x30] sm:$0xff]  ;;  %v200_v20 = vld [vmem:[%s2954_s1 + $0x38] sm:$0xff]  ;;  %v88_v21 = vld [vmem:[%s2953_s0 + $0x48] sm:$0xff] }
  0x3f   :  { %107 = vperm.xlu1 %2402, %v82_v4   ;;  %101 = vperm.xlu0 %2401, %v80_v5   ;;  %v87_v22 = vld [vmem:[%s2953_s0 + $0x40] sm:$0xff]  ;;  %v2182_v23 = vpack.c.bf16 %v200_v20, %v199_v19  ;;  %v202_v25 = vld [vmem:[%s2954_s1 + $0x48] sm:$0xff]  ;;  %v90_v26 = vld [vmem:[%s2953_s0 + $0x58] sm:$0xff]  ;;  %p2484_p13 = por %p2483_p12, %p2482_p11 }
  0x40   :  { %2171 = vmatprep.subr.bf16.mxu0 %v2170_v10  ;;  %v201_v24 = vld [vmem:[%s2954_s1 + $0x40] sm:$0xff]  ;;  %v89_v27 = vld [vmem:[%s2953_s0 + $0x50] sm:$0xff]  ;;  %v204_v30 = vld [vmem:[%s2954_s1 + $0x58] sm:$0xff] }
  0x41   :  { %2173 = vmatpush3.bf16.msra.mxu0 %v2170_v10  ;;  %v2186_v28 = vpack.c.bf16 %v202_v25, %v201_v24  ;;  %v203_v29 = vld [vmem:[%s2954_s1 + $0x50] sm:$0xff]  ;;  %v92_v31 = vld [vmem:[%s2953_s0 + $0x68] sm:$0xff]  ;;  %v91_v32 = vld [vmem:[%s2953_s0 + $0x60] sm:$0xff]  ;;  %p2485_p0 = pnand %p2484_p13, %p2478_p10 }
  0x42   :  { %2175 = vmatprep.subr.bf16.mxu0 %v2174_v13  ;;  %v2190_v33 = vpack.c.bf16 %v204_v30, %v203_v29  ;;  %v205_v34 = vld [vmem:[%s2954_s1 + $0x60] sm:$0xff]  ;;  %v206_v35 = vld [vmem:[%s2954_s1 + $0x68] sm:$0xff]  ;;  %v94_v36 = vld [vmem:[%s2953_s0 + $0x78] sm:$0xff]  ;;  %v2511_v29 = vmov 1.0  }
  0x43   :  { %113 = vperm.xlu1 %2402, %v84_v6   ;;  %110 = vperm.xlu0 %2401, %v83_v9   ;;  %v93_v37 = vld [vmem:[%s2953_s0 + $0x70] sm:$0xff]  ;;  %v2194_v38 = vpack.c.bf16 %v206_v35, %v205_v34  ;;  %v208_v40 = vld [vmem:[%s2954_s1 + $0x78] sm:$0xff]  ;;  %v524_v42 = vld [vmem:[#allocation4 + $0x80] sm:$0xff] }
  0x44   :  { %v207_v39 = vld [vmem:[%s2954_s1 + $0x70] sm:$0xff]  ;;  %v508_v44 = vld [vmem:[#allocation4] sm:$0xff]  ;;  %v527_v52 = vld [vmem:[#allocation4 + $0x98] sm:$0xff] }
  0x45   :  { %2177 = vmatpush3.bf16.msra.mxu0 %v2174_v13  ;;  %v2198_v41 = vpack.c.bf16 %v208_v40, %v207_v39  ;;  %v525_v43 = vld [vmem:[#allocation4 + $0x88] sm:$0xff]  ;;  %v540_v47 = vld [vmem:[#allocation4 + $0x100] sm:$0xff]  ;;  %v526_v51 = vld [vmem:[#allocation4 + $0x90] sm:$0xff] }
  0x46   :  { %2179 = vmatprep.subr.bf16.mxu0 %v2178_v18  ;;  %v2202_v45 = vpack.c.bf16 %v525_v43, %v524_v42  ;;  %v509_v46 = vld [vmem:[#allocation4 + $0x8] sm:$0xff]  ;;  %v510_v53 = vld [vmem:[#allocation4 + $0x10] sm:$0xff]  ;;  %v2206_v54 = vpack.c.bf16 %v527_v52, %v526_v51  ;;  %v511_v55 = vld [vmem:[#allocation4 + $0x18] sm:$0xff] }
  0x47   :  { %119 = vperm.xlu1 %2402, %v86_v16   ;;  %116 = vperm.xlu0 %2401, %v85_v17   ;;  %v541_v48 = vld [vmem:[#allocation4 + $0x108] sm:$0xff]  ;;  %v2204_v49 = vpack.c.bf16 %v509_v46, %v508_v44  ;;  %v2208_v56 = vpack.c.bf16 %v511_v55, %v510_v53  ;;  %v528_v57 = vld [vmem:[#allocation4 + $0xa0] sm:$0xff]  ;;  %v530_v62 = vld [vmem:[#allocation4 + $0xb0] sm:$0xff] }
  0x48   :  { %v2722_v50 = vpack.c.bf16 %v541_v48, %v540_v47  ;;  %2203 = vmatprep.subr.bf16.mxu1 %v2202_v45  ;;  %v529_v58 = vld [vmem:[#allocation4 + $0xa8] sm:$0xff]  ;;  %v512_v60 = vld [vmem:[#allocation4 + $0x20] sm:$0xff]  ;;  %v531_v63 = vld [vmem:[#allocation4 + $0xb8] sm:$0xff] }
  0x49   :  { %2181 = vmatpush3.bf16.msra.mxu0 %v2178_v18  ;;  %2205 = vmatpush3.bf16.msra.mxu1 %v2204_v49  ;;  %v2210_v59 = vpack.c.bf16 %v529_v58, %v528_v57  ;;  %v513_v61 = vld [vmem:[#allocation4 + $0x28] sm:$0xff]  ;;  %v2214_v1 = vpack.c.bf16 %v531_v63, %v530_v62  ;;  %v514_v2 = vld [vmem:[#allocation4 + $0x30] sm:$0xff]  ;;  %v515_v3 = vld [vmem:[#allocation4 + $0x38] sm:$0xff] }
  0x4a   :  { %2183 = vmatprep.subr.bf16.mxu0 %v2182_v23  ;;  %2207 = vmatprep.subr.bf16.mxu1 %v2206_v54  ;;  %v2212_v0 = vpack.c.bf16 %v513_v61, %v512_v60  ;;  %v532_v4 = vld [vmem:[#allocation4 + $0xc0] sm:$0xff]  ;;  %v533_v5 = vld [vmem:[#allocation4 + $0xc8] sm:$0xff]  ;;  %v2216_v6 = vpack.c.bf16 %v515_v3, %v514_v2  ;;  %v534_v10 = vld [vmem:[#allocation4 + $0xd0] sm:$0xff] }
  0x4b   :  { %125 = vperm.xlu1 %2402, %v88_v21   ;;  %122 = vperm.xlu0 %2401, %v87_v22   ;;  %v2218_v7 = vpack.c.bf16 %v533_v5, %v532_v4  ;;  %v516_v8 = vld [vmem:[#allocation4 + $0x40] sm:$0xff]  ;;  %v517_v9 = vld [vmem:[#allocation4 + $0x48] sm:$0xff]  ;;  %v535_v11 = vld [vmem:[#allocation4 + $0xd8] sm:$0xff] }
  0x4c   :  { %v2220_v12 = vpack.c.bf16 %v517_v9, %v516_v8  ;;  %v2222_v13 = vpack.c.bf16 %v535_v11, %v534_v10  ;;  %v518_v14 = vld [vmem:[#allocation4 + $0x50] sm:$0xff]  ;;  %v519_v15 = vld [vmem:[#allocation4 + $0x58] sm:$0xff]  ;;  %v536_v16 = vld [vmem:[#allocation4 + $0xe0] sm:$0xff] }
  0x4d   :  { %2185 = vmatpush3.bf16.msra.mxu0 %v2182_v23  ;;  %2209 = vmatpush3.bf16.msra.mxu1 %v2208_v56  ;;  %v537_v17 = vld [vmem:[#allocation4 + $0xe8] sm:$0xff]  ;;  %v2224_v18 = vpack.c.bf16 %v519_v15, %v518_v14  ;;  %v520_v20 = vld [vmem:[#allocation4 + $0x60] sm:$0xff]  ;;  %v95_v23 = vlaneseq  ;;  %v547_v39 = vld [vmem:[#allocation4 + $0x138] sm:$0xff] }
  0x4e   :  { %2187 = vmatprep.subr.bf16.mxu0 %v2186_v28  ;;  %2211 = vmatprep.subr.bf16.mxu1 %v2210_v59  ;;  %v2226_v19 = vpack.c.bf16 %v537_v17, %v536_v16  ;;  %v521_v21 = vld [vmem:[#allocation4 + $0x68] sm:$0xff]  ;;  %v548_v43 = vld [vmem:[#allocation4 + $0x140] sm:$0xff]  ;;  %v550_v48 = vld [vmem:[#allocation4 + $0x150] sm:$0xff] }
  0x4f   :  { %131 = vperm.xlu1 %2402, %v90_v26   ;;  %128 = vperm.xlu0 %2401, %v89_v27   ;;  %v2228_v22 = vpack.c.bf16 %v521_v21, %v520_v20  ;;  %v2726_v24 = vand.u32 127, %v95_v23  ;;  %v542_v27 = vld [vmem:[#allocation4 + $0x110] sm:$0xff]  ;;  %v545_v34 = vld [vmem:[#allocation4 + $0x128] sm:$0xff]  ;;  %v551_v49 = vld [vmem:[#allocation4 + $0x158] sm:$0xff] }
  0x50   :  { %v549_v44 = vld [vmem:[#allocation4 + $0x148] sm:$0xff]  ;;  %v2254_v52 = vpack.c.bf16 %v551_v49, %v550_v48  ;;  %v552_v57 = vld [vmem:[#allocation4 + $0x160] sm:$0xff]  ;;  %v538_v60 = vld [vmem:[#allocation4 + $0xf0] sm:$0xff] }
  0x51   :  { %2189 = vmatpush3.bf16.msra.mxu0 %v2186_v28  ;;  %2213 = vmatpush3.bf16.msra.mxu1 %v2212_v0  ;;  %v543_v28 = vld [vmem:[#allocation4 + $0x118] sm:$0xff]  ;;  %v2250_v47 = vpack.c.bf16 %v549_v44, %v548_v43  ;;  %v553_v58 = vld [vmem:[#allocation4 + $0x168] sm:$0xff]  ;;  %v522_v63 = vld [vmem:[#allocation4 + $0x70] sm:$0xff] }
  0x52   :  { %2191 = vmatprep.subr.bf16.mxu0 %v2190_v33  ;;  %2215 = vmatprep.subr.bf16.mxu1 %v2214_v1  ;;  %v2258_v59 = vpack.c.bf16 %v553_v58, %v552_v57  ;;  %v539_v61 = vld [vmem:[#allocation4 + $0xf8] sm:$0xff]  ;;  %v554_v2 = vld [vmem:[#allocation4 + $0x170] sm:$0xff] }
  0x53   :  { %137 = vperm.xlu1 %2402, %v92_v31   ;;  %134 = vperm.xlu0 %2401, %v91_v32   ;;  %v2238_v32 = vpack.c.bf16 %v543_v28, %v542_v27  ;;  %v2230_v62 = vpack.c.bf16 %v539_v61, %v538_v60  ;;  %v523_v0 = vld [vmem:[#allocation4 + $0x78] sm:$0xff] }
  0x54   :  { %v2232_v1 = vpack.c.bf16 %v523_v0, %v522_v63  ;;  %v555_v3 = vld [vmem:[#allocation4 + $0x178] sm:$0xff] }
  0x55   :  { %2193 = vmatpush3.bf16.msra.mxu0 %v2190_v33  ;;  %2217 = vmatpush3.bf16.msra.mxu1 %v2216_v6  ;;  %v544_v33 = vld [vmem:[#allocation4 + $0x120] sm:$0xff]  ;;  %v2262_v4 = vpack.c.bf16 %v555_v3, %v554_v2 }
  0x56   :  { %2195 = vmatprep.subr.bf16.mxu0 %v2194_v38  ;;  %2219 = vmatprep.subr.bf16.mxu1 %v2218_v7 }
  0x57   :  { %143 = vperm.xlu1 %2402, %v94_v36   ;;  %140 = vperm.xlu0 %2401, %v93_v37   ;;  %v2242_v37 = vpack.c.bf16 %v545_v34, %v544_v33 }
  0x59   :  { %2197 = vmatpush3.bf16.msra.mxu0 %v2194_v38  ;;  %2221 = vmatpush3.bf16.msra.mxu1 %v2220_v12  ;;  %v546_v38 = vld [vmem:[#allocation4 + $0x130] sm:$0xff] }
  0x5a   :  { %2199 = vmatprep.subr.bf16.mxu0 %v2198_v41  ;;  %2223 = vmatprep.subr.bf16.mxu1 %v2222_v13  ;;  %v2246_v42 = vpack.c.bf16 %v547_v39, %v546_v38 }
  0x5d   :  { %2201 = vmatpush3.bf16.msra.mxu0 %v2198_v41  ;;  %2225 = vmatpush3.bf16.msra.mxu1 %v2224_v18 }
  0x5e   :  { %2235 = vmatprep.subr.bf16.mxu0 %v2722_v50  ;;  %2227 = vmatprep.subr.bf16.mxu1 %v2226_v19 }
  0x61   :  { %2229 = vmatpush3.bf16.msra.mxu1 %v2228_v22 }
  0x62   :  { %2231 = vmatprep.subr.bf16.mxu1 %v2230_v62 }
  0x65   :  { %2233 = vmatpush3.bf16.msra.mxu1 %v2232_v1 }
  0xba   :  { %v105_v25 = vpop.permute.xlu1 %104  ;;  %v99_v26 = vpop.permute.xlu0 %98 }
  0xbb   :  { %vm145_vm0 = vcmp.eq.s32.totalorder %v2726_v24, %v99_v26  ;;  %vm147_vm1 = vcmp.eq.s32.totalorder %v2726_v24, %v105_v25 }
  0xbc   :  { %2005 = vmatprep.mubr.msk.f32.mxu0 %vm145_vm0, %v2511_v29  ;;  %vm362_vm0 = vcmask 1046528  }
  0xbe   :  { %v108_v30 = vpop.permute.xlu1 %107  ;;  %v102_v31 = vpop.permute.xlu0 %101 }
  0xbf   :  { %vm146_vm2 = vcmp.eq.s32.totalorder %v2726_v24, %v102_v31  ;;  %vm148_vm3 = vcmp.eq.s32.totalorder %v2726_v24, %v108_v30 }
  0xc0   :  { %2006 = vmatmul.mubr.msk.f32.vlgmr.msra.gmra.mrb[0].mxu0 %vm146_vm2, %v2511_v29  ;;  %vm968_vm2 = vcmask 1044480  }
  0xc1   :  { %2008 = vmatprep.mubr.msk.f32.mxu0 %vm147_vm1, %v2511_v29  ;;  %2237 = vmatpush3.bf16.msra.mxu0 %v2722_v50  ;;  %vm386_vm1 = vcmask 1045504  }
  0xc2   :  { %v114_v35 = vpop.permute.xlu1 %113  ;;  %v111_v36 = vpop.permute.xlu0 %110  ;;  %2239 = vmatprep.subr.bf16.mxu0 %v2238_v32 }
  0xc3   :  { %vm149_vm4 = vcmp.eq.s32.totalorder %v2726_v24, %v111_v36  ;;  %vm150_vm5 = vcmp.eq.s32.totalorder %v2726_v24, %v114_v35 }
  0xc4   :  { %2009 = vmatmul.mubr.msk.f32.gmra.mrb[2].mxu0 %vm148_vm3, %v2511_v29  ;;  %vm2513_vm3 = vmmov 0  }
  0xc5   :  { %2011 = vmatprep.mubr.msk.f32.mxu0 %vm149_vm4, %v2511_v29  ;;  %2241 = vmatpush3.bf16.msra.mxu0 %v2238_v32  ;;  %vm1325_vm4 = vcmask 1043456  }
  0xc6   :  { %v120_v40 = vpop.permute.xlu1 %119  ;;  %v117_v41 = vpop.permute.xlu0 %116  ;;  %2243 = vmatprep.subr.bf16.mxu0 %v2242_v37 }
  0xc7   :  { %vm151_vm6 = vcmp.eq.s32.totalorder %v2726_v24, %v117_v41  ;;  %vm152_vm7 = vcmp.eq.s32.totalorder %v2726_v24, %v120_v40 }
  0xc8   :  { %2012 = vmatmul.mubr.msk.f32.gmra.mrb[4].mxu0 %vm150_vm5, %v2511_v29  ;;  %vm1594_vm5 = vcmp.eq.s32.totalorder %v2726_v24, 0 }
  0xc9   :  { %2014 = vmatprep.mubr.msk.f32.mxu0 %vm151_vm6, %v2511_v29  ;;  %2245 = vmatpush3.bf16.msra.mxu0 %v2242_v37  ;;  %vm1624_vm6 = vcmp.eq.s32.totalorder %v2726_v24, 1 }
  0xca   :  { %v126_v45 = vpop.permute.xlu1 %125  ;;  %v123_v46 = vpop.permute.xlu0 %122  ;;  %2247 = vmatprep.subr.bf16.mxu0 %v2246_v42 }
  0xcb   :  { %vm153_vm8 = vcmp.eq.s32.totalorder %v2726_v24, %v123_v46  ;;  %vm154_vm9 = vcmp.eq.s32.totalorder %v2726_v24, %v126_v45 }
  0xcc   :  { %2015 = vmatmul.mubr.msk.f32.gmra.mrb[6].mxu0 %vm152_vm7, %v2511_v29 }
  0xcd   :  { %2017 = vmatprep.mubr.msk.f32.mxu0 %vm153_vm8, %v2511_v29  ;;  %2249 = vmatpush3.bf16.msra.mxu0 %v2246_v42 }
  0xce   :  { %v132_v50 = vpop.permute.xlu1 %131  ;;  %v129_v51 = vpop.permute.xlu0 %128  ;;  %2251 = vmatprep.subr.bf16.mxu0 %v2250_v47 }
  0xcf   :  { %vm155_vm10 = vcmp.eq.s32.totalorder %v2726_v24, %v129_v51  ;;  %vm156_vm11 = vcmp.eq.s32.totalorder %v2726_v24, %v132_v50 }
  0xd0   :  { %2018 = vmatmul.mubr.msk.f32.gmra.mrb[8].mxu0 %vm154_vm9, %v2511_v29 }
  0xd1   :  { %2020 = vmatprep.mubr.msk.f32.mxu0 %vm155_vm10, %v2511_v29  ;;  %2253 = vmatpush3.bf16.msra.mxu0 %v2250_v47 }
  0xd2   :  { %v138_v53 = vpop.permute.xlu1 %137  ;;  %v135_v54 = vpop.permute.xlu0 %134  ;;  %2255 = vmatprep.subr.bf16.mxu0 %v2254_v52 }
  0xd3   :  { %vm157_vm12 = vcmp.eq.s32.totalorder %v2726_v24, %v135_v54  ;;  %vm158_vm13 = vcmp.eq.s32.totalorder %v2726_v24, %v138_v53 }
  0xd4   :  { %2021 = vmatmul.mubr.msk.f32.gmra.mrb[10].mxu0 %vm156_vm11, %v2511_v29 }
  0xd5   :  { %2023 = vmatprep.mubr.msk.f32.mxu0 %vm157_vm12, %v2511_v29  ;;  %2257 = vmatpush3.bf16.msra.mxu0 %v2254_v52 }
  0xd6   :  { %v141_v55 = vpop.permute.xlu0 %140  ;;  %v144_v56 = vpop.permute.xlu1 %143  ;;  %2259 = vmatprep.subr.bf16.mxu0 %v2258_v59 }
  0xd7   :  { %vm159_vm14 = vcmp.eq.s32.totalorder %v2726_v24, %v141_v55  ;;  %vm160_vm15 = vcmp.eq.s32.totalorder %v2726_v24, %v144_v56 }
  0xd8   :  { %2024 = vmatmul.mubr.msk.f32.gmra.mrb[12].mxu0 %vm158_vm13, %v2511_v29 }
  0xd9   :  { %2026 = vmatprep.mubr.msk.f32.mxu0 %vm159_vm14, %v2511_v29  ;;  %2261 = vmatpush3.bf16.msra.mxu0 %v2258_v59 }
  0xda   :  { %2263 = vmatprep.subr.bf16.mxu0 %v2262_v4 }
  0xdc   :  { %2027 = vmatmul.mubr.msk.f32.gmra.mrb[14].mxu0 %vm160_vm15, %v2511_v29 }
  0xdd   :  { %2265 = vmatpush3.bf16.msra.mxu0 %v2262_v4 }
 0x193   :  { %v2007_v5 = vpop.f32.mrb[0].mxu0 }
 0x194   :  { %v364_v6 = vrot.slane %v2007_v5, 1  ;;  %v388_v7 = vrot.slane %v2007_v5, 2  ;;  %v275_v8 = vpop.f32.mrb[1].mxu0 }
 0x195   :  { %v363_v9 = vrot.slane %v275_v8, 1  ;;  %v387_v10 = vrot.slane %v275_v8, 2 }
 0x197   :  { %v2010_v11 = vpop.f32.mrb[2].mxu0  ;;  %v365_v12 = vsel %vm362_vm0, %v363_v9, %v364_v6  ;;  %v389_v13 = vsel %vm386_vm1, %v387_v10, %v388_v7 }
 0x198   :  { %v368_v14 = vrot.slane %v2010_v11, 1  ;;  %v392_v15 = vrot.slane %v2010_v11, 2  ;;  %v285_v16 = vpop.f32.mrb[3].mxu0  ;;  %627 = vmatprep.mubr.f32.mxu1 %v365_v12  ;;  %2061 = vmatprep.mubr.f32.mxu0 %v389_v13 }
 0x199   :  { %v366_v17 = vrot.slane %v285_v16, 1  ;;  %v390_v18 = vrot.slane %v285_v16, 2  ;;  %628 = vmatmul.mubr.f32.vlgmr.msra.gmra.mrb[0].mxu1 %v275_v8 }
 0x19b   :  { %v2763_v19 = vpop.f32.mrb[4].mxu0  ;;  %v367_v20 = vsel %vm362_vm0, %v364_v6, %v366_v17  ;;  %v391_v21 = vsel %vm386_vm1, %v388_v7, %v390_v18  ;;  %v393_v22 = vsel %vm386_vm1, %v390_v18, %v392_v15  ;;  %v369_v25 = vsel %vm362_vm0, %v366_v17, %v368_v14 }
 0x19c   :  { %v372_v26 = vrot.slane %v2763_v19, 1  ;;  %v396_v27 = vrot.slane %v2763_v19, 2  ;;  %v295_v28 = vpop.f32.mrb[5].mxu0  ;;  %632 = vmatprep.mubr.f32.mxu1 %v367_v20  ;;  %2062 = vmatmul.mubr.f32.vlgmr.msra.gmra.mrb[16].mxu0 %v391_v21 }
 0x19d   :  { %v370_v29 = vrot.slane %v295_v28, 1  ;;  %v394_v30 = vrot.slane %v295_v28, 2  ;;  %633 = vmatmul.mubr.f32.gmra.mrb[2].mxu1 %v2007_v5  ;;  %2064 = vmatprep.mubr.f32.mxu0 %v393_v22 }
 0x19e   :  { %637 = vmatprep.mubr.f32.mxu1 %v369_v25 }
 0x19f   :  { %v2016_v31 = vpop.f32.mrb[6].mxu0  ;;  %v395_v32 = vsel %vm386_vm1, %v392_v15, %v394_v30  ;;  %v397_v33 = vsel %vm386_vm1, %v394_v30, %v396_v27  ;;  %v371_v34 = vsel %vm362_vm0, %v368_v14, %v370_v29  ;;  %v373_v35 = vsel %vm362_vm0, %v370_v29, %v372_v26 }
 0x1a0   :  { %v376_v36 = vrot.slane %v2016_v31, 1  ;;  %v400_v37 = vrot.slane %v2016_v31, 2  ;;  %v2775_v38 = vpop.f32.mrb[7].mxu0  ;;  %2065 = vmatmul.mubr.f32.gmra.mrb[18].mxu0 %v395_v32 }
 0x1a1   :  { %v374_v39 = vrot.slane %v2775_v38, 1  ;;  %v398_v40 = vrot.slane %v2775_v38, 2  ;;  %638 = vmatmul.mubr.f32.gmra.mrb[4].mxu1 %v285_v16  ;;  %2067 = vmatprep.mubr.f32.mxu0 %v397_v33 }
 0x1a2   :  { %642 = vmatprep.mubr.f32.mxu1 %v371_v34 }
 0x1a3   :  { %v2019_v41 = vpop.f32.mrb[8].mxu0  ;;  %v399_v42 = vsel %vm386_vm1, %v396_v27, %v398_v40  ;;  %v401_v43 = vsel %vm386_vm1, %v398_v40, %v400_v37  ;;  %v375_v44 = vsel %vm362_vm0, %v372_v26, %v374_v39  ;;  %v377_v45 = vsel %vm362_vm0, %v374_v39, %v376_v36 }
 0x1a4   :  { %v419_v46 = vrot.slane %v2019_v41, 1  ;;  %v434_v47 = vrot.slane %v2019_v41, 2  ;;  %v315_v48 = vpop.f32.mrb[9].mxu0  ;;  %2068 = vmatmul.mubr.f32.gmra.mrb[20].mxu0 %v399_v42 }
 0x1a5   :  { %v418_v49 = vrot.slane %v315_v48, 1  ;;  %v433_v50 = vrot.slane %v315_v48, 2  ;;  %643 = vmatmul.mubr.f32.gmra.mrb[6].mxu1 %v2010_v11  ;;  %2070 = vmatprep.mubr.f32.mxu0 %v401_v43 }
 0x1a6   :  { %647 = vmatprep.mubr.f32.mxu1 %v373_v35 }
 0x1a7   :  { %v420_v51 = vsel %vm362_vm0, %v418_v49, %v419_v46  ;;  %v2785_v52 = vsel %vm386_vm1, %v433_v50, %v434_v47  ;;  %v2022_v53 = vpop.f32.mrb[10].mxu0  ;;  %v505_v54 = vsel %vm386_vm1, %v2016_v31, %v433_v50 }
 0x1a8   :  { %v423_v55 = vrot.slane %v2022_v53, 1  ;;  %v438_v56 = vrot.slane %v2022_v53, 2  ;;  %v325_v57 = vpop.f32.mrb[11].mxu0  ;;  %v449_v58 = vrot.slane %v2785_v52, 2  ;;  %v448_v59 = vrot.slane %v420_v51, 2 }
 0x1a9   :  { %v421_v60 = vrot.slane %v325_v57, 1  ;;  %v436_v61 = vrot.slane %v325_v57, 2  ;;  %648 = vmatmul.mubr.f32.gmra.mrb[8].mxu1 %v295_v28  ;;  %v1008_v57 = vld [vmem:[#allocation7] sm:$0xff] }
 0x1aa   :  { %652 = vmatprep.mubr.f32.mxu1 %v375_v44  ;;  %v507_v62 = vsel %vm386_vm1, %v400_v37, %v449_v58  ;;  %v506_v63 = vsel %vm386_vm1, %v376_v36, %v448_v59 }
 0x1ab   :  { %v422_v0 = vsel %vm362_vm0, %v419_v46, %v421_v60  ;;  %v424_v1 = vsel %vm362_vm0, %v421_v60, %v423_v55  ;;  %v2794_v2 = vsel %vm386_vm1, %v434_v47, %v436_v61  ;;  %v2797_v3 = vsel %vm386_vm1, %v436_v61, %v438_v56  ;;  %v2025_v4 = vpop.f32.mrb[12].mxu0  ;;  %2071 = vmatmul.mubr.f32.gmra.mrb[22].mxu0 %v507_v62  ;;  %v1026_v60 = vld [vmem:[#allocation7 + $0x90] sm:$0xff]  ;;  %v1027_v61 = vld [vmem:[#allocation7 + $0x98] sm:$0xff] }
 0x1ac   :  { %v427_v5 = vrot.slane %v2025_v4, 1  ;;  %v442_v6 = vrot.slane %v2025_v4, 2  ;;  %v335_v7 = vpop.f32.mrb[13].mxu0  ;;  %v452_v8 = vrot.slane %v2794_v2, 2  ;;  %v456_v9 = vrot.slane %v2797_v3, 2 }
 0x1ad   :  { %v425_v10 = vrot.slane %v335_v7, 1  ;;  %v440_v11 = vrot.slane %v335_v7, 2  ;;  %653 = vmatmul.mubr.f32.gmra.mrb[10].mxu1 %v2763_v19  ;;  %v450_v12 = vrot.slane %v422_v0, 2  ;;  %v454_v13 = vrot.slane %v424_v1, 2  ;;  %v1011_v0 = vld [vmem:[#allocation7 + $0x18] sm:$0xff] }
 0x1ae   :  { %657 = vmatprep.mubr.f32.mxu1 %v377_v45  ;;  %v453_v14 = vsel %vm386_vm1, %v449_v58, %v452_v8  ;;  %v457_v15 = vsel %vm386_vm1, %v452_v8, %v456_v9  ;;  %v1009_v58 = vld [vmem:[#allocation7 + $0x8] sm:$0xff]  ;;  %v2270_v62 = vpack.c.bf16 %v1027_v61, %v1026_v60  ;;  %v1012_v8 = vld [vmem:[#allocation7 + $0x20] sm:$0xff]  ;;  %v1054_v61 = vld [vmem:[#allocation7 + $0x170] sm:$0xff] }
 0x1af   :  { %v426_v16 = vsel %vm362_vm0, %v423_v55, %v425_v10  ;;  %v428_v17 = vsel %vm362_vm0, %v425_v10, %v427_v5  ;;  %v441_v18 = vsel %vm386_vm1, %v438_v56, %v440_v11  ;;  %v443_v20 = vsel %vm386_vm1, %v440_v11, %v442_v6  ;;  %v2028_v21 = vpop.f32.mrb[14].mxu0  ;;  %2073 = vmatprep.mubr.f32.mxu0 %v453_v14  ;;  %v1024_v55 = vld [vmem:[#allocation7 + $0x80] sm:$0xff]  ;;  %v1042_v11 = vld [vmem:[#allocation7 + $0x110] sm:$0xff] }
 0x1b0   :  { %v431_v22 = vrot.slane %v2028_v21, 1  ;;  %v446_v25 = vrot.slane %v2028_v21, 2  ;;  %v345_v19 = vpop.f32.mrb[15].mxu0  ;;  %2074 = vmatmul.mubr.f32.gmra.mrb[24].mxu0 %v457_v15  ;;  %v460_v26 = vrot.slane %v441_v18, 2  ;;  %v464_v27 = vrot.slane %v443_v20, 2  ;;  %v1030_v14 = vld [vmem:[#allocation7 + $0xb0] sm:$0xff] }
 0x1b1   :  { %v429_v28 = vrot.slane %v345_v19, 1  ;;  %v444_v29 = vrot.slane %v345_v19, 2  ;;  %658 = vmatmul.mubr.f32.gmra.mrb[12].mxu1 %v2775_v38  ;;  %v451_v30 = vsel %vm386_vm1, %v448_v59, %v450_v12  ;;  %v455_v31 = vsel %vm386_vm1, %v450_v12, %v454_v13  ;;  %v1043_v12 = vld [vmem:[#allocation7 + $0x118] sm:$0xff]  ;;  %v1044_v21 = vld [vmem:[#allocation7 + $0x120] sm:$0xff] }
 0x1b2   :  { %662 = vmatprep.mubr.f32.mxu1 %v506_v63  ;;  %v461_v32 = vsel %vm386_vm1, %v456_v9, %v460_v26  ;;  %v465_v33 = vsel %vm386_vm1, %v460_v26, %v464_v27  ;;  %v476_v34 = vrot.slane %v446_v25, 2  ;;  %v458_v41 = vrot.slane %v426_v16, 2  ;;  %v1010_v63 = vld [vmem:[#allocation7 + $0x10] sm:$0xff]  ;;  %v1013_v9 = vld [vmem:[#allocation7 + $0x28] sm:$0xff]  ;;  %v1031_v15 = vld [vmem:[#allocation7 + $0xb8] sm:$0xff] }
 0x1b3   :  { %v430_v35 = vsel %vm362_vm0, %v427_v5, %v429_v28  ;;  %v432_v36 = vsel %vm362_vm0, %v429_v28, %v431_v22  ;;  %v445_v37 = vsel %vm386_vm1, %v442_v6, %v444_v29  ;;  %v447_v39 = vsel %vm386_vm1, %v444_v29, %v446_v25  ;;  %2076 = vmatprep.mubr.f32.mxu0 %v461_v32  ;;  %v1028_v5 = vld [vmem:[#allocation7 + $0xa0] sm:$0xff]  ;;  %v1029_v6 = vld [vmem:[#allocation7 + $0xa8] sm:$0xff]  ;;  %v1047_v32 = vld [vmem:[#allocation7 + $0x138] sm:$0xff] }
 0x1b4   :  { %2077 = vmatmul.mubr.f32.gmra.mrb[26].mxu0 %v465_v33  ;;  %v468_v38 = vrot.slane %v445_v37, 2  ;;  %v472_v40 = vrot.slane %v447_v39, 2  ;;  %v462_v42 = vrot.slane %v428_v17, 2  ;;  %v474_v43 = vrot.slane %v431_v22, 2  ;;  %v1014_v17 = vld [vmem:[#allocation7 + $0x30] sm:$0xff]  ;;  %v1045_v22 = vld [vmem:[#allocation7 + $0x128] sm:$0xff] }
 0x1b5   :  { %663 = vmatmul.mubr.f32.gmra.mrb[14].mxu1 %v505_v54  ;;  %v466_v44 = vrot.slane %v430_v35, 2  ;;  %v470_v45 = vrot.slane %v432_v36, 2  ;;  %v459_v49 = vsel %vm386_vm1, %v454_v13, %v458_v41  ;;  %v2268_v59 = vpack.c.bf16 %v1009_v58, %v1008_v57  ;;  %v1032_v19 = vld [vmem:[#allocation7 + $0xc0] sm:$0xff]  ;;  %v1033_v26 = vld [vmem:[#allocation7 + $0xc8] sm:$0xff]  ;;  %v1035_v35 = vld [vmem:[#allocation7 + $0xd8] sm:$0xff] }
 0x1b6   :  { %667 = vmatprep.mubr.f32.mxu1 %v451_v30  ;;  %v469_v46 = vsel %vm386_vm1, %v464_v27, %v468_v38  ;;  %v473_v47 = vsel %vm386_vm1, %v468_v38, %v472_v40  ;;  %v477_v48 = vsel %vm386_vm1, %v472_v40, %v476_v34  ;;  %v463_v50 = vsel %vm386_vm1, %v458_v41, %v462_v42  ;;  %v1016_v28 = vld [vmem:[#allocation7 + $0x40] sm:$0xff]  ;;  %v1017_v29 = vld [vmem:[#allocation7 + $0x48] sm:$0xff] }
 0x1b7   :  { %2079 = vmatprep.mubr.f32.mxu0 %v469_v46  ;;  %v467_v51 = vsel %vm386_vm1, %v462_v42, %v466_v44  ;;  %v471_v53 = vsel %vm386_vm1, %v466_v44, %v470_v45  ;;  %v475_v54 = vsel %vm386_vm1, %v470_v45, %v474_v43  ;;  %v2272_v1 = vpack.c.bf16 %v1011_v0, %v1010_v63  ;;  %v1048_v40 = vld [vmem:[#allocation7 + $0x140] sm:$0xff]  ;;  %v1049_v41 = vld [vmem:[#allocation7 + $0x148] sm:$0xff] }
 0x1b8   :  { %2080 = vmatmul.mubr.f32.gmra.mrb[28].mxu0 %v473_v47  ;;  %v2274_v7 = vpack.c.bf16 %v1029_v6, %v1028_v5  ;;  %v2276_v10 = vpack.c.bf16 %v1013_v9, %v1012_v8  ;;  %v2302_v13 = vpack.c.bf16 %v1043_v12, %v1042_v11  ;;  %v2278_v16 = vpack.c.bf16 %v1031_v15, %v1030_v14  ;;  %v1037_v44 = vld [vmem:[#allocation7 + $0xe8] sm:$0xff]  ;;  %v1020_v46 = vld [vmem:[#allocation7 + $0x60] sm:$0xff] }
 0x1b9   :  { %668 = vmatmul.mubr.f32.gmra.mrb[16].mxu1 %v2785_v52  ;;  %2082 = vmatprep.mubr.f32.mxu0 %v477_v48  ;;  %v1025_v52 = vld [vmem:[#allocation7 + $0x88] sm:$0xff]  ;;  %v2282_v27 = vpack.c.bf16 %v1033_v26, %v1032_v19  ;;  %v2284_v30 = vpack.c.bf16 %v1017_v29, %v1016_v28  ;;  %v2314_v42 = vpack.c.bf16 %v1049_v41, %v1048_v40  ;;  %v1052_v58 = vld [vmem:[#allocation7 + $0x160] sm:$0xff] }
 0x1ba   :  { %672 = vmatprep.mubr.f32.mxu1 %v455_v31  ;;  %v2266_v56 = vpack.c.bf16 %v1025_v52, %v1024_v55  ;;  %v1046_v31 = vld [vmem:[#allocation7 + $0x130] sm:$0xff]  ;;  %v1021_v47 = vld [vmem:[#allocation7 + $0x68] sm:$0xff] }
 0x1bb   :  { %v2310_v33 = vpack.c.bf16 %v1047_v32, %v1046_v31  ;;  %v2292_v48 = vpack.c.bf16 %v1021_v47, %v1020_v46  ;;  %v1022_v52 = vld [vmem:[#allocation7 + $0x70] sm:$0xff] }
 0x1bc   :  { %2083 = vmatmul.mubr.f32.gmra.mrb[30].mxu0 %v476_v34  ;;  %2267 = vmatprep.subr.bf16.mxu0 %v2266_v56  ;;  %v1034_v34 = vld [vmem:[#allocation7 + $0xd0] sm:$0xff]  ;;  %v1023_v56 = vld [vmem:[#allocation7 + $0x78] sm:$0xff] }
 0x1bd   :  { %673 = vmatmul.mubr.f32.gmra.mrb[18].mxu1 %v2794_v2  ;;  %2269 = vmatpush3.bf16.msra.mxu0 %v2268_v59  ;;  %v1040_v2 = vld [vmem:[#allocation7 + $0x100] sm:$0xff]  ;;  %v2286_v36 = vpack.c.bf16 %v1035_v35, %v1034_v34  ;;  %v2296_v57 = vpack.c.bf16 %v1023_v56, %v1022_v52  ;;  %v1053_v59 = vld [vmem:[#allocation7 + $0x168] sm:$0xff] }
 0x1be   :  { %677 = vmatprep.mubr.f32.mxu1 %v459_v49  ;;  %2271 = vmatprep.subr.bf16.mxu0 %v2270_v62  ;;  %v1050_v49 = vld [vmem:[#allocation7 + $0x150] sm:$0xff]  ;;  %v2322_v60 = vpack.c.bf16 %v1053_v59, %v1052_v58  ;;  %v1055_v62 = vld [vmem:[#allocation7 + $0x178] sm:$0xff] }
 0x1bf   :  { %v2326_v63 = vpack.c.bf16 %v1055_v62, %v1054_v61 }
 0x1c1   :  { %678 = vmatmul.mubr.f32.gmra.mrb[20].mxu1 %v2797_v3  ;;  %v1041_v3 = vld [vmem:[#allocation7 + $0x108] sm:$0xff]  ;;  %2273 = vmatpush3.bf16.msra.mxu0 %v2272_v1 }
 0x1c2   :  { %682 = vmatprep.mubr.f32.mxu1 %v463_v50  ;;  %v2298_v4 = vpack.c.bf16 %v1041_v3, %v1040_v2  ;;  %2275 = vmatprep.subr.bf16.mxu0 %v2274_v7  ;;  %v1051_v50 = vld [vmem:[#allocation7 + $0x158] sm:$0xff] }
 0x1c3   :  { %v2831_v2 = vld [vmem:[%s2956_s3] ss:$0 sm:$0xff] }
 0x1c4   :  { %2299 = vmatprep.subr.bf16.mxu1 %v2298_v4 }
 0x1c5   :  { %683 = vmatmul.mubr.f32.gmra.mrb[22].mxu1 %v441_v18  ;;  %2277 = vmatpush3.bf16.msra.mxu0 %v2276_v10  ;;  %v1015_v18 = vld [vmem:[#allocation7 + $0x38] sm:$0xff] }
 0x1c6   :  { %687 = vmatprep.mubr.f32.mxu1 %v467_v51  ;;  %2301 = vmatpush3.bf16.msra.mxu1 %v2298_v4  ;;  %v2318_v51 = vpack.c.bf16 %v1051_v50, %v1050_v49 }
 0x1c7   :  { %2303 = vmatprep.subr.bf16.mxu1 %v2302_v13  ;;  %2279 = vmatprep.subr.bf16.mxu0 %v2278_v16 }
 0x1c9   :  { %688 = vmatmul.mubr.f32.gmra.mrb[24].mxu1 %v443_v20  ;;  %v2280_v20 = vpack.c.bf16 %v1015_v18, %v1014_v17 }
 0x1ca   :  { %692 = vmatprep.mubr.f32.mxu1 %v471_v53  ;;  %2305 = vmatpush3.bf16.msra.mxu1 %v2302_v13  ;;  %v1038_v53 = vld [vmem:[#allocation7 + $0xf0] sm:$0xff] }
 0x1cb   :  { %2281 = vmatpush3.bf16.msra.mxu0 %v2280_v20 }
 0x1cc   :  { %2283 = vmatprep.subr.bf16.mxu0 %v2282_v27 }
 0x1cd   :  { %693 = vmatmul.mubr.f32.gmra.mrb[26].mxu1 %v445_v37  ;;  %v1018_v37 = vld [vmem:[#allocation7 + $0x50] sm:$0xff] }
 0x1ce   :  { %697 = vmatprep.mubr.f32.mxu1 %v475_v54  ;;  %v1039_v54 = vld [vmem:[#allocation7 + $0xf8] sm:$0xff] }
 0x1cf   :  { %2285 = vmatpush3.bf16.msra.mxu0 %v2284_v30  ;;  %v2294_v55 = vpack.c.bf16 %v1039_v54, %v1038_v53 }
 0x1d0   :  { %2287 = vmatprep.subr.bf16.mxu0 %v2286_v36 }
 0x1d1   :  { %698 = vmatmul.mubr.f32.gmra.mrb[28].mxu1 %v447_v39  ;;  %v1019_v39 = vld [vmem:[#allocation7 + $0x58] sm:$0xff] }
 0x1d2   :  { %702 = vmatprep.mubr.f32.mxu1 %v474_v43  ;;  %v2288_v38 = vpack.c.bf16 %v1019_v39, %v1018_v37  ;;  %v1036_v43 = vld [vmem:[#allocation7 + $0xe0] sm:$0xff] }
 0x1d3   :  { %v2290_v45 = vpack.c.bf16 %v1037_v44, %v1036_v43 }
 0x1d4   :  { %2289 = vmatpush3.bf16.msra.mxu0 %v2288_v38 }
 0x1d5   :  { %703 = vmatmul.mubr.f32.gmra.mrb[30].mxu1 %v446_v25  ;;  %v2306_v25 = vpack.c.bf16 %v1045_v22, %v1044_v21  ;;  %2291 = vmatprep.subr.bf16.mxu0 %v2290_v45 }
 0x1d7   :  { %2307 = vmatprep.subr.bf16.mxu1 %v2306_v25 }
 0x1d8   :  { %2309 = vmatpush3.bf16.msra.mxu1 %v2306_v25  ;;  %2293 = vmatpush3.bf16.msra.mxu0 %v2292_v48 }
 0x1d9   :  { %2311 = vmatprep.subr.bf16.mxu1 %v2310_v33  ;;  %2295 = vmatprep.subr.bf16.mxu0 %v2294_v55 }
 0x1dc   :  { %2313 = vmatpush3.bf16.msra.mxu1 %v2310_v33  ;;  %2297 = vmatpush3.bf16.msra.mxu0 %v2296_v57 }
 0x1dd   :  { %2315 = vmatprep.subr.bf16.mxu1 %v2314_v42 }
 0x1e0   :  { %2317 = vmatpush3.bf16.msra.mxu1 %v2314_v42 }
 0x1e1   :  { %2319 = vmatprep.subr.bf16.mxu1 %v2318_v51 }
 0x1e4   :  { %2321 = vmatpush3.bf16.msra.mxu1 %v2318_v51 }
 0x1e5   :  { %2323 = vmatprep.subr.bf16.mxu1 %v2322_v60 }
 0x1e8   :  { %2325 = vmatpush3.bf16.msra.mxu1 %v2322_v60 }
 0x1e9   :  { %2327 = vmatprep.subr.bf16.mxu1 %v2326_v63 }
 0x1ec   :  { %2329 = vmatpush3.bf16.msra.mxu1 %v2326_v63 }
 0x26c   :  { %v1753_v0 = vpop.f32.mrb[0].mxu1 }
 0x26d   :  { %v1754_v1 = vpop.f32.mrb[1].mxu1 }
 0x26e   :  { %v1755_v3 = vadd.f32 %v1754_v1, %v1753_v0 }
 0x26f   :  { %v2063_v4 = vpop.f32.mrb[16].mxu0 }
 0x270   :  { %v1756_v5 = vpop.f32.mrb[2].mxu1  ;;  %v630_v6 = vadd.f32 %v1755_v3, %v2831_v2  ;;  %v774_v7 = vpop.f32.mrb[17].mxu0 }
 0x271   :  { %v1757_v8 = vpop.f32.mrb[3].mxu1 }
 0x272   :  { %v775_v9 = vadd.f32 %v774_v7, %v630_v6  ;;  %v1758_v10 = vadd.f32 %v1757_v8, %v1756_v5 }
 0x273   :  { %v2066_v11 = vpop.f32.mrb[18].mxu0 }
 0x274   :  { %v853_v12 = vmax.f32 %v775_v9, 0.0  ;;  %v635_v13 = vadd.f32 %v1758_v10, %v2831_v2  ;;  %v1759_v14 = vpop.f32.mrb[4].mxu1  ;;  %v784_v15 = vpop.f32.mrb[19].mxu0 }
 0x275   :  { %v1760_v16 = vpop.f32.mrb[5].mxu1 }
 0x276   :  { %869 = vst [vmem:[#allocation2] sm:$0xff] %v853_v12  ;;  %v780_v17 = vadd.f32 %v2063_v4, %v635_v13  ;;  %v1761_v18 = vadd.f32 %v1760_v16, %v1759_v14 }
 0x277   :  { %v2069_v20 = vpop.f32.mrb[20].mxu0 }
 0x278   :  { %v854_v21 = vmax.f32 %v780_v17, 0.0  ;;  %v640_v22 = vadd.f32 %v1761_v18, %v2831_v2  ;;  %v1762_v25 = vpop.f32.mrb[6].mxu1  ;;  %v794_v19 = vpop.f32.mrb[21].mxu0 }
 0x279   :  { %v1763_v26 = vpop.f32.mrb[7].mxu1 }
 0x27a   :  { %870 = vst [vmem:[#allocation2 + $0x8] sm:$0xff] %v854_v21  ;;  %v785_v27 = vadd.f32 %v784_v15, %v640_v22  ;;  %v1764_v28 = vadd.f32 %v1763_v26, %v1762_v25 }
 0x27c   :  { %v855_v29 = vmax.f32 %v785_v27, 0.0  ;;  %v645_v30 = vadd.f32 %v1764_v28, %v2831_v2  ;;  %v1765_v31 = vpop.f32.mrb[8].mxu1 }
 0x27d   :  { %v1766_v32 = vpop.f32.mrb[9].mxu1 }
 0x27e   :  { %871 = vst [vmem:[#allocation2 + $0x10] sm:$0xff] %v855_v29  ;;  %v790_v33 = vadd.f32 %v2066_v11, %v645_v30  ;;  %v1767_v34 = vadd.f32 %v1766_v32, %v1765_v31  ;;  %v2072_v35 = vpop.f32.mrb[22].mxu0 }
 0x27f   :  { %v804_v36 = vpop.f32.mrb[23].mxu0 }
 0x280   :  { %v856_v37 = vmax.f32 %v790_v33, 0.0  ;;  %v650_v39 = vadd.f32 %v1767_v34, %v2831_v2  ;;  %v1768_v38 = vpop.f32.mrb[10].mxu1 }
 0x281   :  { %v1769_v40 = vpop.f32.mrb[11].mxu1  ;;  %v885_v44 = vld [vmem:[#allocation2] ss:$2 sm:$0xff]  ;;  %v893_v49 = vld [vmem:[#allocation2 + $0x1] ss:$2 sm:$0xff] }
 0x282   :  { %872 = vst [vmem:[#allocation2 + $0x18] sm:$0xff] %v856_v37  ;;  %v795_v41 = vadd.f32 %v794_v19, %v650_v39  ;;  %v1770_v42 = vadd.f32 %v1769_v40, %v1768_v38  ;;  %v900_v55 = vmax.f32 %v885_v44, %v893_v49 }
 0x283   :  { %v2075_v43 = vpop.f32.mrb[24].mxu0 }
 0x284   :  { %v857_v45 = vmax.f32 %v795_v41, 0.0  ;;  %v655_v46 = vadd.f32 %v1770_v42, %v2831_v2  ;;  %v1771_v47 = vpop.f32.mrb[12].mxu1  ;;  %v814_v48 = vpop.f32.mrb[25].mxu0  ;;  %v928_v3 = vrot.slane %v900_v55, 1  ;;  %v939_v4 = vrot.slane %v900_v55, 2 }
 0x285   :  { %v1772_v50 = vpop.f32.mrb[13].mxu1 }
 0x286   :  { %873 = vst [vmem:[#allocation2 + $0x20] sm:$0xff] %v857_v45  ;;  %v800_v51 = vadd.f32 %v2069_v20, %v655_v46  ;;  %v1773_v53 = vadd.f32 %v1772_v50, %v1771_v47 }
 0x287   :  { %v2839_v54 = vpop.f32.mrb[26].mxu0 }
 0x288   :  { %v858_v52 = vmax.f32 %v800_v51, 0.0  ;;  %v660_v56 = vadd.f32 %v1773_v53, %v2831_v2  ;;  %v1774_v57 = vpop.f32.mrb[14].mxu1  ;;  %v824_v58 = vpop.f32.mrb[27].mxu0 }
 0x289   :  { %v1775_v59 = vpop.f32.mrb[15].mxu1  ;;  %v887_v60 = vld [vmem:[#allocation2 + $0x10] ss:$2 sm:$0xff]  ;;  %v895_v61 = vld [vmem:[#allocation2 + $0x11] ss:$2 sm:$0xff] }
 0x28a   :  { %874 = vst [vmem:[#allocation2 + $0x28] sm:$0xff] %v858_v52  ;;  %v805_v62 = vadd.f32 %v804_v36, %v660_v56  ;;  %v1776_v63 = vadd.f32 %v1775_v59, %v1774_v57  ;;  %v901_v0 = vmax.f32 %v887_v60, %v895_v61 }
 0x28b   :  { %v2842_v1 = vpop.f32.mrb[28].mxu0 }
 0x28c   :  { %v859_v5 = vmax.f32 %v805_v62, 0.0  ;;  %v665_v6 = vadd.f32 %v1776_v63, %v2831_v2  ;;  %v1777_v7 = vpop.f32.mrb[16].mxu1  ;;  %v2845_v8 = vpop.f32.mrb[29].mxu0  ;;  %v929_v9 = vrot.slane %v901_v0, 1  ;;  %v940_v10 = vrot.slane %v901_v0, 2 }
 0x28d   :  { %v1778_v11 = vpop.f32.mrb[17].mxu1 }
 0x28e   :  { %875 = vst [vmem:[#allocation2 + $0x30] sm:$0xff] %v859_v5  ;;  %v810_v12 = vadd.f32 %v2072_v35, %v665_v6  ;;  %v1779_v13 = vadd.f32 %v1778_v11, %v1777_v7  ;;  %v930_v14 = vsel %vm362_vm0, %v928_v3, %v929_v9  ;;  %v941_v15 = vsel %vm386_vm1, %v939_v4, %v940_v10 }
 0x28f   :  { %v2849_v16 = vpop.f32.mrb[30].mxu0  ;;  %1127 = vmatprep.mubr.f32.mxu0 %v930_v14  ;;  %2117 = vmatprep.mubr.f32.mxu1 %v941_v15 }
 0x290   :  { %v860_v17 = vmax.f32 %v810_v12, 0.0  ;;  %v670_v18 = vadd.f32 %v1779_v13, %v2831_v2  ;;  %v1780_v20 = vpop.f32.mrb[18].mxu1  ;;  %v2852_v21 = vpop.f32.mrb[31].mxu0  ;;  %1128 = vmatmul.mubr.f32.vlgmr.msra.gmra.mrb[32].mxu0 %v900_v55 }
 0x291   :  { %v1781_v22 = vpop.f32.mrb[19].mxu1  ;;  %v889_v25 = vld [vmem:[#allocation2 + $0x20] ss:$2 sm:$0xff]  ;;  %v897_v19 = vld [vmem:[#allocation2 + $0x21] ss:$2 sm:$0xff] }
 0x292   :  { %876 = vst [vmem:[#allocation2 + $0x38] sm:$0xff] %v860_v17  ;;  %v815_v26 = vadd.f32 %v814_v48, %v670_v18  ;;  %v1782_v27 = vadd.f32 %v1781_v22, %v1780_v20  ;;  %v902_v28 = vmax.f32 %v889_v25, %v897_v19 }
 0x294   :  { %v861_v29 = vmax.f32 %v815_v26, 0.0  ;;  %v675_v30 = vadd.f32 %v1782_v27, %v2831_v2  ;;  %v1783_v31 = vpop.f32.mrb[20].mxu1  ;;  %v931_v32 = vrot.slane %v902_v28, 1  ;;  %v942_v33 = vrot.slane %v902_v28, 2 }
 0x295   :  { %v1784_v34 = vpop.f32.mrb[21].mxu1 }
 0x296   :  { %877 = vst [vmem:[#allocation2 + $0x40] sm:$0xff] %v861_v29  ;;  %v820_v35 = vadd.f32 %v2075_v43, %v675_v30  ;;  %v1785_v36 = vadd.f32 %v1784_v34, %v1783_v31  ;;  %v932_v37 = vsel %vm362_vm0, %v929_v9, %v931_v32  ;;  %v943_v39 = vsel %vm386_vm1, %v940_v10, %v942_v33 }
 0x297   :  { %1132 = vmatprep.mubr.f32.mxu0 %v932_v37  ;;  %2118 = vmatmul.mubr.f32.vlgmr.msra.gmra.mrb[32].mxu1 %v943_v39 }
 0x298   :  { %v862_v38 = vmax.f32 %v820_v35, 0.0  ;;  %v680_v40 = vadd.f32 %v1785_v36, %v2831_v2  ;;  %v1786_v41 = vpop.f32.mrb[22].mxu1  ;;  %1133 = vmatmul.mubr.f32.gmra.mrb[34].mxu0 %v901_v0 }
 0x299   :  { %v1787_v42 = vpop.f32.mrb[23].mxu1  ;;  %v891_v44 = vld [vmem:[#allocation2 + $0x30] ss:$2 sm:$0x7f] }
 0x29a   :  { %878 = vst [vmem:[#allocation2 + $0x48] sm:$0xff] %v862_v38  ;;  %v825_v45 = vadd.f32 %v824_v58, %v680_v40  ;;  %v1788_v46 = vadd.f32 %v1787_v42, %v1786_v41  ;;  %v899_v47 = vld [vmem:[#allocation2 + $0x31] ss:$2 sm:$0x7f] }
 0x29b   :  { %v2858_v48 = vmax.f32 %v891_v44, %v899_v47 }
 0x29c   :  { %v863_v43 = vmax.f32 %v825_v45, 0.0  ;;  %v685_v49 = vadd.f32 %v1788_v46, %v2831_v2  ;;  %v1789_v50 = vpop.f32.mrb[24].mxu1 }
 0x29d   :  { %v1790_v51 = vpop.f32.mrb[25].mxu1  ;;  %v933_v53 = vrot.slane %v2858_v48, 1  ;;  %v944_v55 = vrot.slane %v2858_v48, 2 }
 0x29e   :  { %879 = vst [vmem:[#allocation2 + $0x50] sm:$0xff] %v863_v43  ;;  %v830_v52 = vadd.f32 %v2839_v54, %v685_v49  ;;  %v1791_v56 = vadd.f32 %v1790_v51, %v1789_v50 }
 0x29f   :  { %v934_v57 = vsel %vm362_vm0, %v931_v32, %v933_v53  ;;  %v945_v58 = vsel %vm386_vm1, %v942_v33, %v944_v55 }
 0x2a0   :  { %v864_v59 = vmax.f32 %v830_v52, 0.0  ;;  %v690_v60 = vadd.f32 %v1791_v56, %v2831_v2  ;;  %1137 = vmatprep.mubr.f32.mxu0 %v934_v57  ;;  %2120 = vmatprep.mubr.f32.mxu1 %v945_v58  ;;  %v1792_v61 = vpop.f32.mrb[26].mxu1 }
 0x2a1   :  { %1138 = vmatmul.mubr.f32.gmra.mrb[36].mxu0 %v902_v28  ;;  %v1793_v62 = vpop.f32.mrb[27].mxu1  ;;  %v905_v5 = vld [vmem:[#allocation2 + $0x3e] ss:$2 sm:$0xff]  ;;  %v913_v6 = vld [vmem:[#allocation2 + $0x3f] ss:$2 sm:$0xff] }
 0x2a2   :  { %880 = vst [vmem:[#allocation2 + $0x58] sm:$0xff] %v864_v59  ;;  %v835_v63 = vadd.f32 %v2845_v8, %v690_v60  ;;  %v1794_v0 = vadd.f32 %v1793_v62, %v1792_v61  ;;  %v920_v11 = vmax.f32 %v905_v5, %v913_v6  ;;  %v1360_v6 = vld [vmem:[#allocation9 + $0x80] sm:$0xff] }
 0x2a4   :  { %v865_v3 = vmax.f32 %v835_v63, 0.0  ;;  %v695_v54 = vadd.f32 %v1794_v0, %v2831_v2  ;;  %v1795_v4 = vpop.f32.mrb[28].mxu1  ;;  %v954_v25 = vrot.slane %v920_v11, 1  ;;  %v961_v19 = vrot.slane %v920_v11, 2 }
 0x2a5   :  { %v1796_v7 = vpop.f32.mrb[29].mxu1  ;;  %v969_v32 = vrot.slane %v920_v11, 3 }
 0x2a6   :  { %881 = vst [vmem:[#allocation2 + $0x60] sm:$0xff] %v865_v3  ;;  %v840_v9 = vadd.f32 %v2842_v1, %v695_v54  ;;  %v1797_v10 = vadd.f32 %v1796_v7, %v1795_v4  ;;  %v1361_v7 = vld [vmem:[#allocation9 + $0x88] sm:$0xff] }
 0x2a7   :  { %v2330_v11 = vpack.c.bf16 %v1361_v7, %v1360_v6 }
 0x2a8   :  { %v866_v12 = vmax.f32 %v840_v9, 0.0  ;;  %v700_v13 = vadd.f32 %v1797_v10, %v2831_v2  ;;  %v1798_v14 = vpop.f32.mrb[30].mxu1  ;;  %v1376_v9 = vld [vmem:[#allocation9 + $0x100] sm:$0xff]  ;;  %v2512_v10 = vmov 0.0|0.0  }
 0x2a9   :  { %v1799_v15 = vpop.f32.mrb[31].mxu1  ;;  %v907_v17 = vld [vmem:[#allocation2 + $0x4e] ss:$2 sm:$0xff]  ;;  %v915_v8 = vld [vmem:[#allocation2 + $0x4f] ss:$2 sm:$0xff]  ;;  %2362 = vmatprep.subr.bf16.mxu1 %v2512_v10  ;;  %2331 = vmatprep.subr.bf16.mxu0 %v2330_v11 }
 0x2aa   :  { %882 = vst [vmem:[#allocation2 + $0x68] sm:$0xff] %v866_v12  ;;  %v845_v18 = vadd.f32 %v2852_v21, %v700_v13  ;;  %v1800_v20 = vadd.f32 %v1799_v15, %v1798_v14  ;;  %v921_v22 = vmax.f32 %v907_v17, %v915_v8  ;;  %v1377_v12 = vld [vmem:[#allocation9 + $0x108] sm:$0xff]  ;;  %v1344_v13 = vld [vmem:[#allocation9] sm:$0xff]  ;;  %v1362_v8 = vld [vmem:[#allocation9 + $0x90] sm:$0xff] }
 0x2ab   :  { %v1345_v14 = vld [vmem:[#allocation9 + $0x8] sm:$0xff]  ;;  %v2363_v15 = vpack.c.bf16 %v1377_v12, %v1376_v9  ;;  %v1374_v9 = vld [vmem:[#allocation9 + $0xf0] sm:$0xff]  ;;  %v1375_v11 = vld [vmem:[#allocation9 + $0xf8] sm:$0xff] }
 0x2ac   :  { %v867_v26 = vmax.f32 %v845_v18, 0.0  ;;  %v705_v27 = vadd.f32 %v1800_v20, %v2831_v2  ;;  %v955_v1 = vrot.slane %v921_v22, 1  ;;  %v962_v28 = vrot.slane %v921_v22, 2  ;;  %v1363_v18 = vld [vmem:[#allocation9 + $0x98] sm:$0xff]  ;;  %v1378_v20 = vld [vmem:[#allocation9 + $0x110] sm:$0xff] }
 0x2ad   :  { %v972_v44 = vrot.slane %v921_v22, 3  ;;  %v2332_v17 = vpack.c.bf16 %v1345_v14, %v1344_v13  ;;  %v2334_v22 = vpack.c.bf16 %v1363_v18, %v1362_v8  ;;  %2364 = vmatpush3.bf16.msra.mxu1 %v2363_v15  ;;  %v1390_v12 = vld [vmem:[#allocation9 + $0x170] sm:$0xff]  ;;  %v2358_v13 = vpack.c.bf16 %v1375_v11, %v1374_v9  ;;  %v1391_v14 = vld [vmem:[#allocation9 + $0x178] sm:$0xff] }
 0x2ae   :  { %883 = vst [vmem:[#allocation2 + $0x70] sm:$0xff] %v867_v26  ;;  %v850_v29 = vadd.f32 %v2849_v16, %v705_v27  ;;  %v956_v30 = vsel %vm362_vm0, %v954_v25, %v955_v1  ;;  %v963_v31 = vsel %vm386_vm1, %v961_v19, %v962_v28  ;;  %v1005_v16 = vsel %vm968_vm2, %v2858_v48, %v969_v32  ;;  %v1379_v25 = vld [vmem:[#allocation9 + $0x118] sm:$0xff]  ;;  %v1346_v19 = vld [vmem:[#allocation9 + $0x10] sm:$0xff] }
 0x2af   :  { %v970_v33 = vrot.slane %v956_v30, 3  ;;  %v971_v21 = vrot.slane %v963_v31, 3  ;;  %v973_v48 = vsel %vm968_vm2, %v969_v32, %v972_v44  ;;  %v1347_v26 = vld [vmem:[#allocation9 + $0x18] sm:$0xff]  ;;  %2333 = vmatpush3.bf16.msra.mxu0 %v2332_v17  ;;  %v2366_v27 = vpack.c.bf16 %v1379_v25, %v1378_v20  ;;  %2365 = vmatprep.subr.bf16.mxu1 %v2512_v10  ;;  %v1380_v30 = vld [vmem:[#allocation9 + $0x120] sm:$0xff]  ;;  %v1381_v32 = vld [vmem:[#allocation9 + $0x128] sm:$0xff] }
 0x2b0   :  { %v868_v34 = vmax.f32 %v850_v29, 0.0  ;;  %2335 = vmatprep.subr.bf16.mxu0 %v2334_v22  ;;  %v1365_v29 = vld [vmem:[#allocation9 + $0xa8] sm:$0xff]  ;;  %v1358_v15 = vld [vmem:[#allocation9 + $0x70] sm:$0xff]  ;;  %v1359_v17 = vld [vmem:[#allocation9 + $0x78] sm:$0xff]  ;;  %v2384_v8 = vpack.c.bf16 %v1391_v14, %v1390_v12  ;;  %v2514_v20 = vmov 0.0  }
 0x2b1   :  { %v1006_v35 = vsel %vm968_vm2, %v933_v53, %v970_v33  ;;  %v1007_v36 = vsel %vm968_vm2, %v944_v55, %v971_v21  ;;  %v909_v37 = vld [vmem:[#allocation2 + $0x5e] ss:$2 sm:$0xff]  ;;  %v917_v2 = vld [vmem:[#allocation2 + $0x5f] ss:$2 sm:$0xff]  ;;  %2367 = vmatpush3.bf16.msra.mxu1 %v2366_v27  ;;  %v2360_v18 = vpack.c.bf16 %v1359_v17, %v1358_v15 }
 0x2b2   :  { %884 = vst [vmem:[#allocation2 + $0x78] sm:$0xf] %v868_v34  ;;  %1142 = vmatprep.mubr.f32.mxu0 %v1006_v35  ;;  %2121 = vmatmul.mubr.f32.gmra.mrb[34].mxu1 %v1007_v36  ;;  %v922_v39 = vmax.f32 %v909_v37, %v917_v2  ;;  %v2369_v34 = vpack.c.bf16 %v1381_v32, %v1380_v30  ;;  %v1366_v36 = vld [vmem:[#allocation9 + $0xb0] sm:$0xff]  ;;  %v1367_v37 = vld [vmem:[#allocation9 + $0xb8] sm:$0xff] }
 0x2b3   :  { %1143 = vmatmul.mubr.f32.gmra.mrb[38].mxu0 %v1005_v16  ;;  %2368 = vmatprep.subr.bf16.mxu1 %v2512_v10  ;;  %v1382_v2 = vld [vmem:[#allocation9 + $0x130] sm:$0xff]  ;;  %v2342_v16 = vpack.c.bf16 %v1367_v37, %v1366_v36 }
 0x2b4   :  { %v957_v38 = vrot.slane %v922_v39, 1  ;;  %v964_v40 = vrot.slane %v922_v39, 2  ;;  %v978_v57 = vrot.slane %v922_v39, 3  ;;  %v1383_v39 = vld [vmem:[#allocation9 + $0x138] sm:$0xff] }
 0x2b5   :  { %2370 = vmatpush3.bf16.msra.mxu1 %v2369_v34 }
 0x2b6   :  { %v958_v41 = vsel %vm362_vm0, %v955_v1, %v957_v38  ;;  %v965_v42 = vsel %vm386_vm1, %v962_v28, %v964_v40  ;;  %v979_v3 = vsel %vm968_vm2, %v972_v44, %v978_v57  ;;  %v2336_v1 = vpack.c.bf16 %v1347_v26, %v1346_v19  ;;  %v1364_v28 = vld [vmem:[#allocation9 + $0xa0] sm:$0xff]  ;;  %2371 = vmatprep.subr.bf16.mxu1 %v2512_v10 }
 0x2b7   :  { %v974_v45 = vrot.slane %v958_v41, 3  ;;  %v976_v46 = vrot.slane %v965_v42, 3  ;;  %v2338_v31 = vpack.c.bf16 %v1365_v29, %v1364_v28  ;;  %v2372_v41 = vpack.c.bf16 %v1383_v39, %v1382_v2  ;;  %v1368_v44 = vld [vmem:[#allocation9 + $0xc0] sm:$0xff] }
 0x2b8   :  { %2337 = vmatpush3.bf16.msra.mxu0 %v2336_v1 }
 0x2b9   :  { %v975_v47 = vsel %vm968_vm2, %v970_v33, %v974_v45  ;;  %v977_v43 = vsel %vm968_vm2, %v971_v21, %v976_v46  ;;  %v911_v49 = vld [vmem:[#allocation2 + $0x6e] ss:$2 sm:$0x7f]  ;;  %v919_v50 = vld [vmem:[#allocation2 + $0x6f] ss:$2 sm:$0x7f]  ;;  %2339 = vmatprep.subr.bf16.mxu0 %v2338_v31  ;;  %2373 = vmatpush3.bf16.msra.mxu1 %v2372_v41 }
 0x2ba   :  { %1147 = vmatprep.mubr.f32.mxu0 %v975_v47  ;;  %2123 = vmatprep.mubr.f32.mxu1 %v977_v43  ;;  %v923_v51 = vmax.f32 %v911_v49, %v919_v50  ;;  %v1348_v33 = vld [vmem:[#allocation9 + $0x20] sm:$0xff]  ;;  %v1349_v21 = vld [vmem:[#allocation9 + $0x28] sm:$0xff] }
 0x2bb   :  { %1148 = vmatmul.mubr.f32.gmra.mrb[40].mxu0 %v973_v48  ;;  %v2340_v35 = vpack.c.bf16 %v1349_v21, %v1348_v33  ;;  %2374 = vmatprep.subr.bf16.mxu1 %v2512_v10  ;;  %v1385_v43 = vld [vmem:[#allocation9 + $0x148] sm:$0xff]  ;;  %v1352_v49 = vld [vmem:[#allocation9 + $0x40] sm:$0xff] }
 0x2bc   :  { %v959_v53 = vrot.slane %v923_v51, 1  ;;  %v966_v55 = vrot.slane %v923_v51, 2  ;;  %v984_v54 = vrot.slane %v923_v51, 3  ;;  %v1353_v50 = vld [vmem:[#allocation9 + $0x48] sm:$0xff] }
 0x2bd   :  { %2341 = vmatpush3.bf16.msra.mxu0 %v2340_v35  ;;  %v2348_v51 = vpack.c.bf16 %v1353_v50, %v1352_v49 }
 0x2be   :  { %v960_v52 = vsel %vm362_vm0, %v957_v38, %v959_v53  ;;  %v967_v56 = vsel %vm386_vm1, %v964_v40, %v966_v55  ;;  %v988_v58 = vrot.slane %v966_v55, 3  ;;  %v986_v61 = vrot.slane %v959_v53, 3  ;;  %v1350_v38 = vld [vmem:[#allocation9 + $0x30] sm:$0xff]  ;;  %v1351_v40 = vld [vmem:[#allocation9 + $0x38] sm:$0xff]  ;;  %2343 = vmatprep.subr.bf16.mxu0 %v2342_v16 }
 0x2bf   :  { %v980_v59 = vrot.slane %v960_v52, 3  ;;  %v982_v60 = vrot.slane %v967_v56, 3  ;;  %v985_v5 = vsel %vm968_vm2, %v978_v57, %v984_v54  ;;  %v2344_v42 = vpack.c.bf16 %v1351_v40, %v1350_v38  ;;  %v1370_v53 = vld [vmem:[#allocation9 + $0xd0] sm:$0xff]  ;;  %v1371_v55 = vld [vmem:[#allocation9 + $0xd8] sm:$0xff] }
 0x2c0   :  { %v1386_v52 = vld [vmem:[#allocation9 + $0x150] sm:$0xff]  ;;  %v2350_v56 = vpack.c.bf16 %v1371_v55, %v1370_v53  ;;  %v1387_v57 = vld [vmem:[#allocation9 + $0x158] sm:$0xff] }
 0x2c1   :  { %v981_v62 = vsel %vm968_vm2, %v974_v45, %v980_v59  ;;  %v983_v63 = vsel %vm968_vm2, %v976_v46, %v982_v60  ;;  %v989_v0 = vsel %vm968_vm2, %v982_v60, %v988_v58  ;;  %v987_v4 = vsel %vm968_vm2, %v980_v59, %v986_v61  ;;  %2345 = vmatpush3.bf16.msra.mxu0 %v2344_v42  ;;  %v1369_v45 = vld [vmem:[#allocation9 + $0xc8] sm:$0xff]  ;;  %v1384_v46 = vld [vmem:[#allocation9 + $0x140] sm:$0xff]  ;;  %v1355_v59 = vld [vmem:[#allocation9 + $0x58] sm:$0xff] }
 0x2c2   :  { %1152 = vmatprep.mubr.f32.mxu0 %v981_v62  ;;  %2124 = vmatmul.mubr.f32.gmra.mrb[36].mxu1 %v983_v63  ;;  %v2346_v47 = vpack.c.bf16 %v1369_v45, %v1368_v44  ;;  %v2375_v48 = vpack.c.bf16 %v1385_v43, %v1384_v46  ;;  %v2378_v60 = vpack.c.bf16 %v1387_v57, %v1386_v52  ;;  %v1372_v62 = vld [vmem:[#allocation9 + $0xe0] sm:$0xff]  ;;  %v1373_v63 = vld [vmem:[#allocation9 + $0xe8] sm:$0xff] }
 0x2c3   :  { %1153 = vmatmul.mubr.f32.gmra.mrb[42].mxu0 %v979_v3  ;;  %2126 = vmatprep.mubr.f32.mxu1 %v989_v0  ;;  %v1388_v0 = vld [vmem:[#allocation9 + $0x160] sm:$0xff]  ;;  %v2354_v3 = vpack.c.bf16 %v1373_v63, %v1372_v62 }
 0x2c4   :  { %1157 = vmatprep.mubr.f32.mxu0 %v987_v4  ;;  %2347 = vmatprep.subr.bf16.mxu0 %v2346_v47  ;;  %v1356_v4 = vld [vmem:[#allocation9 + $0x60] sm:$0xff] }
 0x2c5   :  { %2376 = vmatpush3.bf16.msra.mxu1 %v2375_v48  ;;  %2349 = vmatpush3.bf16.msra.mxu0 %v2348_v51 }
 0x2c6   :  { %2127 = vmatmul.mubr.f32.gmra.mrb[38].mxu1 %v988_v58  ;;  %v1354_v58 = vld [vmem:[#allocation9 + $0x50] sm:$0xff]  ;;  %2377 = vmatprep.subr.bf16.mxu1 %v2512_v10 }
 0x2c7   :  { %1158 = vmatmul.mubr.f32.gmra.mrb[44].mxu0 %v985_v5  ;;  %2351 = vmatprep.subr.bf16.mxu0 %v2350_v56  ;;  %v1357_v5 = vld [vmem:[#allocation9 + $0x68] sm:$0xff] }
 0x2c8   :  { %1162 = vmatprep.mubr.f32.mxu0 %v986_v61  ;;  %v2352_v61 = vpack.c.bf16 %v1355_v59, %v1354_v58  ;;  %v2356_v7 = vpack.c.bf16 %v1357_v5, %v1356_v4  ;;  %2161 = vmatprep.mubr.msk.f32.mxu1 %vm2513_vm3, %v2514_v20 }
 0x2c9   :  { %2379 = vmatpush3.bf16.msra.mxu1 %v2378_v60 }
 0x2ca   :  { %2353 = vmatpush3.bf16.msra.mxu0 %v2352_v61  ;;  %2380 = vmatprep.subr.bf16.mxu1 %v2512_v10 }
 0x2cb   :  { %1163 = vmatmul.mubr.f32.gmra.mrb[46].mxu0 %v984_v54  ;;  %v1389_v54 = vld [vmem:[#allocation9 + $0x168] sm:$0xff]  ;;  %2355 = vmatprep.subr.bf16.mxu0 %v2354_v3 }
 0x2cc   :  { %v2381_v6 = vpack.c.bf16 %v1389_v54, %v1388_v0 }
 0x2ce   :  { %2382 = vmatpush3.bf16.msra.mxu1 %v2381_v6  ;;  %2357 = vmatpush3.bf16.msra.mxu0 %v2356_v7 }
 0x2cf   :  { %2383 = vmatprep.subr.bf16.mxu1 %v2512_v10  ;;  %2359 = vmatprep.subr.bf16.mxu0 %v2358_v13  ;;  %v2906_v10 = vld [vmem:[%s2958_s5] ss:$0 sm:$0xff] }
 0x2d2   :  { %2385 = vmatpush3.bf16.msra.mxu1 %v2384_v8  ;;  %2361 = vmatpush3.bf16.msra.mxu0 %v2360_v18 }
 0x363   :  { %v1865_v22 = vpop.f32.mrb[32].mxu0 }
 0x364   :  { %v1866_v25 = vpop.f32.mrb[33].mxu0 }
 0x365   :  { %v1867_v19 = vadd.f32 %v1866_v25, %v1865_v22 }
 0x367   :  { %v1130_v27 = vadd.f32 %v1867_v19, %v2906_v10 }
 0x36a   :  { %v2119_v26 = vpop.f32.mrb[32].mxu1 }
 0x36b   :  { %v1868_v1 = vpop.f32.mrb[34].mxu0  ;;  %v1234_v28 = vpop.f32.mrb[33].mxu1 }
 0x36c   :  { %v1235_v29 = vadd.f32 %v1234_v28, %v1130_v27  ;;  %v1869_v30 = vpop.f32.mrb[35].mxu0 }
 0x36d   :  { %v1870_v31 = vadd.f32 %v1869_v30, %v1868_v1 }
 0x36e   :  { %v1273_v32 = vmax.f32 %v1235_v29, 0.0 }
 0x36f   :  { %v1135_v33 = vadd.f32 %v1870_v31, %v2906_v10 }
 0x370   :  { %1281 = vst [vmem:[#allocation2] sm:$0xff] %v1273_v32 }
 0x371   :  { %v1240_v21 = vadd.f32 %v2119_v26, %v1135_v33 }
 0x373   :  { %v1274_v34 = vmax.f32 %v1240_v21, 0.0 }
 0x374   :  { %v1871_v35 = vpop.f32.mrb[36].mxu0 }
 0x375   :  { %1282 = vst [vmem:[#allocation2 + $0x8] sm:$0xff] %v1274_v34  ;;  %v1872_v36 = vpop.f32.mrb[37].mxu0 }
 0x376   :  { %v1873_v37 = vadd.f32 %v1872_v36, %v1871_v35 }
 0x378   :  { %v1140_v16 = vadd.f32 %v1873_v37, %v2906_v10 }
 0x37c   :  { %v1289_v48 = vld [vmem:[#allocation2] ss:$2 sm:$0xff]  ;;  %v1291_v51 = vld [vmem:[#allocation2 + $0x1] ss:$2 sm:$0xff] }
 0x37d   :  { %v1293_v60 = vmax.f32 %v1289_v48, %v1291_v51 }
 0x37f   :  { %v1307_v7 = vrot.slane %v1293_v60, 1  ;;  %v1312_v11 = vrot.slane %v1293_v60, 2 }
 0x385   :  { %v2122_v2 = vpop.f32.mrb[34].mxu1 }
 0x386   :  { %v1874_v39 = vpop.f32.mrb[38].mxu0  ;;  %v1244_v38 = vpop.f32.mrb[35].mxu1 }
 0x387   :  { %v1245_v40 = vadd.f32 %v1244_v38, %v1140_v16  ;;  %v1875_v41 = vpop.f32.mrb[39].mxu0 }
 0x388   :  { %v1876_v42 = vadd.f32 %v1875_v41, %v1874_v39 }
 0x389   :  { %v1275_v44 = vmax.f32 %v1245_v40, 0.0 }
 0x38a   :  { %v1145_v45 = vadd.f32 %v1876_v42, %v2906_v10 }
 0x38b   :  { %1283 = vst [vmem:[#allocation2 + $0x10] sm:$0xff] %v1275_v44 }
 0x38c   :  { %v1250_v46 = vadd.f32 %v2122_v2, %v1145_v45 }
 0x38e   :  { %v1276_v47 = vmax.f32 %v1250_v46, 0.0  ;;  %v1877_v43 = vpop.f32.mrb[40].mxu0 }
 0x38f   :  { %v1878_v49 = vpop.f32.mrb[41].mxu0 }
 0x390   :  { %1284 = vst [vmem:[#allocation2 + $0x18] sm:$0xff] %v1276_v47  ;;  %v1879_v50 = vadd.f32 %v1878_v49, %v1877_v43 }
 0x392   :  { %v1150_v55 = vadd.f32 %v1879_v50, %v2906_v10 }
 0x395   :  { %v2125_v53 = vpop.f32.mrb[36].mxu1 }
 0x396   :  { %v1880_v52 = vpop.f32.mrb[42].mxu0  ;;  %v1254_v56 = vpop.f32.mrb[37].mxu1 }
 0x397   :  { %v1255_v57 = vadd.f32 %v1254_v56, %v1150_v55  ;;  %v1881_v58 = vpop.f32.mrb[43].mxu0  ;;  %v1290_v59 = vld [vmem:[#allocation2 + $0x10] ss:$2 sm:$0x3f]  ;;  %v1686_v55 = vld [vmem:[%s2960_s7] ss:$0 sm:$0xff] }
 0x398   :  { %v1882_v61 = vadd.f32 %v1881_v58, %v1880_v52  ;;  %v1292_v62 = vld [vmem:[#allocation2 + $0x11] ss:$2 sm:$0x3f] }
 0x399   :  { %v1277_v63 = vmax.f32 %v1255_v57, 0.0  ;;  %v2128_v0 = vpop.f32.mrb[38].mxu1  ;;  %v1294_v3 = vmax.f32 %v1290_v59, %v1292_v62 }
 0x39a   :  { %v1155_v54 = vadd.f32 %v1882_v61, %v2906_v10  ;;  %v1883_v4 = vpop.f32.mrb[44].mxu0  ;;  %v1264_v5 = vpop.f32.mrb[39].mxu1 }
 0x39b   :  { %1285 = vst [vmem:[#allocation2 + $0x20] sm:$0xff] %v1277_v63  ;;  %v1884_v6 = vpop.f32.mrb[45].mxu0  ;;  %v1308_v9 = vrot.slane %v1294_v3, 1  ;;  %v1313_v12 = vrot.slane %v1294_v3, 2 }
 0x39c   :  { %v1260_v13 = vadd.f32 %v2125_v53, %v1155_v54  ;;  %v1885_v14 = vadd.f32 %v1884_v6, %v1883_v4 }
 0x39d   :  { %v1309_v15 = vsel %vm362_vm0, %v1307_v7, %v1308_v9  ;;  %v1314_v17 = vsel %vm386_vm1, %v1312_v11, %v1313_v12 }
 0x39e   :  { %v1278_v8 = vmax.f32 %v1260_v13, 0.0  ;;  %v1160_v18 = vadd.f32 %v1885_v14, %v2906_v10  ;;  %1463 = vmatprep.mubr.f32.mxu0 %v1309_v15  ;;  %2162 = vmatmul.mubr.f32.vlgmr.msra.gmra.mrb[40].mxu1 %v1314_v17  ;;  %v1886_v22 = vpop.f32.mrb[46].mxu0  ;;  %v1573_v14 = vld [vmem:[%s2961_s8] sm:$0x3f] }
 0x39f   :  { %1464 = vmatmul.mubr.f32.vlgmr.msra.gmra.mrb[48].mxu0 %v1293_v60  ;;  %v1887_v25 = vpop.f32.mrb[47].mxu0  ;;  %2164 = vmatprep.mubr.msk.f32.mxu1 %vm2513_vm3, %v2514_v20 }
 0x3a0   :  { %1286 = vst [vmem:[#allocation2 + $0x28] sm:$0xff] %v1278_v8  ;;  %v1265_v19 = vadd.f32 %v1264_v5, %v1160_v18  ;;  %v1888_v26 = vadd.f32 %v1887_v25, %v1886_v22 }
 0x3a2   :  { %v1279_v27 = vmax.f32 %v1265_v19, 0.0  ;;  %v1165_v1 = vadd.f32 %v1888_v26, %v2906_v10 }
 0x3a4   :  { %1287 = vst [vmem:[#allocation2 + $0x30] sm:$0xff] %v1279_v27  ;;  %v1270_v28 = vadd.f32 %v2128_v0, %v1165_v1 }
 0x3a6   :  { %v1280_v29 = vmax.f32 %v1270_v28, 0.0 }
 0x3a7   :  { %v1296_v30 = vld [vmem:[#allocation2 + $0x1d] ss:$2 sm:$0xff]  ;;  %v1300_v31 = vld [vmem:[#allocation2 + $0x1e] ss:$2 sm:$0xff] }
 0x3a8   :  { %1288 = vst [vmem:[#allocation2 + $0x38] sm:$0x3] %v1280_v29  ;;  %v1303_v32 = vmax.f32 %v1296_v30, %v1300_v31 }
 0x3aa   :  { %v1319_v35 = vrot.slane %v1303_v32, 1  ;;  %v1322_v37 = vrot.slane %v1303_v32, 2  ;;  %v1326_v38 = vrot.slane %v1303_v32, 4 }
 0x3ab   :  { %v1298_v33 = vld [vmem:[#allocation2 + $0x2d] ss:$2 sm:$0x3f] }
 0x3ac   :  { %v1341_v46 = vsel %vm1325_vm4, %v1294_v3, %v1326_v38 }
 0x3af   :  { %v1302_v21 = vld [vmem:[#allocation2 + $0x2e] ss:$2 sm:$0x3f] }
 0x3b0   :  { %v1304_v34 = vmax.f32 %v1298_v33, %v1302_v21 }
 0x3b2   :  { %v1320_v36 = vrot.slane %v1304_v34, 1  ;;  %v1323_v2 = vrot.slane %v1304_v34, 2  ;;  %v1329_v47 = vrot.slane %v1304_v34, 4 }
 0x3b4   :  { %v1321_v16 = vsel %vm362_vm0, %v1319_v35, %v1320_v36  ;;  %v1324_v39 = vsel %vm386_vm1, %v1322_v37, %v1323_v2  ;;  %v1331_v41 = vrot.slane %v1320_v36, 4  ;;  %v1333_v45 = vrot.slane %v1323_v2, 4 }
 0x3b5   :  { %v1327_v10 = vrot.slane %v1321_v16, 4  ;;  %v1328_v40 = vrot.slane %v1324_v39, 4  ;;  %v1330_v50 = vsel %vm1325_vm4, %v1326_v38, %v1329_v47  ;;  %v1586_v38 = vld [vmem:[#allocation3] sm:$0x1] }
 0x3b7   :  { %v1342_v42 = vsel %vm1325_vm4, %v1308_v9, %v1327_v10  ;;  %v1343_v44 = vsel %vm1325_vm4, %v1313_v12, %v1328_v40  ;;  %v1332_v43 = vsel %vm1325_vm4, %v1327_v10, %v1331_v41  ;;  %v1334_v49 = vsel %vm1325_vm4, %v1328_v40, %v1333_v45 }
 0x3b8   :  { %1468 = vmatprep.mubr.f32.mxu0 %v1342_v42  ;;  %2165 = vmatmul.mubr.f32.gmra.mrb[42].mxu1 %v1343_v44 }
 0x3b9   :  { %1469 = vmatmul.mubr.f32.gmra.mrb[50].mxu0 %v1341_v46  ;;  %2167 = vmatprep.mubr.msk.f32.mxu1 %vm2513_vm3, %v2514_v20 }
 0x3ba   :  { %1473 = vmatprep.mubr.f32.mxu0 %v1332_v43 }
 0x3bc   :  { %2168 = vmatmul.mubr.f32.gmra.mrb[44].mxu1 %v1334_v49 }
 0x3bd   :  { %1474 = vmatmul.mubr.f32.gmra.mrb[52].mxu0 %v1330_v50 }
 0x471   :  { %v1545_v48 = vpop.f32.mrb[40].mxu1 }
 0x472   :  { %v1945_v51 = vpop.f32.mrb[48].mxu0  ;;  %v2163_v53 = vpop.f32.mrb[41].mxu1 }
 0x473   :  { %v1946_v52 = vpop.f32.mrb[49].mxu0 }
 0x474   :  { %v1947_v56 = vadd.f32 %v1946_v52, %v1945_v51  ;;  %v1601_v51 = vshrl.u32 %v95_v23, 7 }
 0x476   :  { %v1466_v57 = vadd.f32 %v1947_v56, %v1686_v55  ;;  %v1602_v53 = vsub.s32 0, %v1601_v51 }
 0x478   :  { %v1546_v58 = vadd.f32 %v1545_v48, %v1466_v57 }
 0x47a   :  { %v1559_v59 = vmax.f32 %v1546_v58, 0.0 }
 0x47c   :  { %1562 = vst [vmem:[#allocation2] sm:$0xff] %v1559_v59 }
 0x48b   :  { %v1550_v20 = vpop.f32.mrb[42].mxu1 }
 0x48c   :  { %v1948_v60 = vpop.f32.mrb[50].mxu0  ;;  %v2166_v61 = vpop.f32.mrb[43].mxu1 }
 0x48d   :  { %v1949_v62 = vpop.f32.mrb[51].mxu0 }
 0x48e   :  { %v1950_v63 = vadd.f32 %v1949_v62, %v1948_v60 }
 0x48f   :  { %v1555_v0 = vpop.f32.mrb[44].mxu1 }
 0x490   :  { %v1471_v3 = vadd.f32 %v1950_v63, %v1686_v55  ;;  %v1951_v54 = vpop.f32.mrb[52].mxu0  ;;  %v2169_v4 = vpop.f32.mrb[45].mxu1 }
 0x491   :  { %v1952_v5 = vpop.f32.mrb[53].mxu0 }
 0x492   :  { %v1551_v6 = vadd.f32 %v1550_v20, %v1471_v3  ;;  %v1953_v7 = vadd.f32 %v1952_v5, %v1951_v54 }
 0x494   :  { %v1560_v9 = vmax.f32 %v1551_v6, 0.0  ;;  %v1476_v11 = vadd.f32 %v1953_v7, %v1686_v55 }
 0x496   :  { %1563 = vst [vmem:[#allocation2 + $0x8] sm:$0xff] %v1560_v9  ;;  %v1556_v12 = vadd.f32 %v1555_v0, %v1476_v11 }
 0x498   :  { %v1561_v13 = vmax.f32 %v1556_v12, 0.0 }
 0x49a   :  { %1564 = vst [vmem:[#allocation2 + $0x10] sm:$0xff] %v1561_v13 }
 0x49d   :  { %v1565_v15 = vld [vmem:[#allocation2] ss:$2 sm:$0x3f]  ;;  %v1566_v17 = vld [vmem:[#allocation2 + $0x1] ss:$2 sm:$0x3f] }
 0x49e   :  { %v1567_v8 = vmax.f32 %v1565_v15, %v1566_v17 }
 0x4a0   :  { %v1574_v18 = vmul.f32 %v1573_v14, %v1567_v8 }
 0x4a1   :  { %v1569_v22 = vld [vmem:[#allocation2 + $0xc] ss:$2 sm:$0x3f]  ;;  %v1571_v25 = vld [vmem:[#allocation2 + $0xd] ss:$2 sm:$0x3f] }
 0x4a2   :  { %v1575_v19 = vsel %vm386_vm1, %v1574_v18, 0.0  ;;  %v1572_v26 = vmax.f32 %v1569_v22, %v1571_v25 }
 0x4a3   :  { %1576 = vadd.xlane.f32.xlu0 %v1575_v19 }
 0x4a4   :  { %v1605_v27 = vmul.f32 %v1573_v14, %v1572_v26 }
 0x4a6   :  { %v1606_v1 = vsel %vm386_vm1, %v1605_v27, 0.0 }
 0x4a7   :  { %1607 = vadd.xlane.f32.xlu1 %v1606_v1 }
 0x530   :  { %v1577_v28 = vpop.xlane.xlu0 %1576 }
 0x531   :  { %v1578_v29 = vrot.slane %v1577_v28, 4 }
 0x533   :  { %v1579_v30 = vadd.f32 %v1578_v29, %v1577_v28 }
 0x534   :  { %v1608_v31 = vpop.xlane.xlu1 %1607 }
 0x535   :  { %v1580_v32 = vrot.slane %v1579_v30, 2  ;;  %v1609_v33 = vrot.slane %v1608_v31, 4 }
 0x537   :  { %v1610_v21 = vadd.f32 %v1609_v33, %v1608_v31  ;;  %v1581_v34 = vadd.f32 %v1580_v32, %v1579_v30 }
 0x539   :  { %v1611_v35 = vrot.slane %v1610_v21, 2  ;;  %v1582_v36 = vrot.slane %v1581_v34, 1 }
 0x53b   :  { %v1583_v37 = vadd.f32 %v1582_v36, %v1581_v34  ;;  %v1612_v2 = vadd.f32 %v1611_v35, %v1610_v21 }
 0x53d   :  { %2386 = vpush %v1583_v37  ;;  %v1613_v16 = vrot.slane %v1612_v2, 1 }
 0x53f   :  { %v1614_v39 = vadd.f32 %v1613_v16, %v1612_v2 }
 0x541   :  { %2388 = vpush %v1614_v39 }
 0x56e   :  { %s2387_s8 = spop %2386 }
 0x56f   :  { %v1585_v10 = vstv %s2387_s8 }
 0x570   :  { %v1587_v40 = vadd.f32 %v1586_v38, %v1585_v10 }
 0x572   :  { %v1687_v41 = vmul.f32 -1.442695, %v1587_v40  ;;  %s2389_s28 = spop %2388 }
 0x573   :  { %v1616_v42 = vstv %s2389_s28 }
 0x574   :  { %2403 = vpow2.f32 %v1687_v41  ;;  %v1617_v44 = vadd.f32 %v1616_v42, %v1586_v38 }
 0x576   :  { %v1688_v45 = vmul.f32 -1.442695, %v1617_v44 }
 0x578   :  { %2405 = vpow2.f32 %v1688_v45 }
 0x57e   :  { %v2404_v46 = vpop.eup %2403 }
 0x57f   :  { %v1591_v47 = vadd.f32 1.0, %v2404_v46 }
 0x581   :  { %2407 = vrcp.f32 %v1591_v47 }
 0x582   :  { %v2406_v43 = vpop.eup %2405 }
 0x583   :  { %v1621_v49 = vadd.f32 1.0, %v2406_v43 }
 0x585   :  { %2409 = vrcp.f32 %v1621_v49 }
 0x58b   :  { %v2408_v50 = vpop.eup %2407 }
 0x58c   :  { %1597 = vperm.xlu0 %2401, %v2408_v50  }
 0x58f   :  { %v2410_v48 = vpop.eup %2409 }
 0x590   :  { %1627 = vperm.xlu1 %2402, %v2410_v48  }
 0x60b   :  { %v1598_v55 = vpop.permute.xlu0 %1597 }
 0x60c   :  { %v1603_v52 = vrot.slane %v1598_v55, %v1602_v53 }
 0x60e   :  { %v1604_v58 = vsel %vm1594_vm5, %v1603_v52, 0.0 }
 0x60f   :  { %v1628_v56 = vpop.permute.xlu1 %1627 }
 0x610   :  { %v1633_v57 = vrot.slane %v1628_v56, %v1602_v53 }
 0x612   :  { %v1634_v59 = vsel %vm1624_vm6, %v1633_v57, %v1604_v58 }
 0x613   :  { %1635 = vst [vmem:[#allocation10] sm:$0x1] %v1634_v59 }
 0x614   :  { %2488 = shalt.err (!%p2485_p0)
}
 0x615   :  { %s2489_s13 = scalar_lea.hbm %s2963_s10, 16 }
 0x616   :  { %p2490_p1 = scmp.ne.s32.totalorder %s2963_s10, %s2489_s13  ;;  %p2493_p2 = scmp.lt.u32.totalorder %s2489_s13, %s2963_s10 }
 0x618   :  { %p2495_p3 = pnand %p2493_p2, %p2490_p1 }
 0x61a   :  { %2498 = shalt.err (!%p2495_p3)
}
 0x61b   :  { %1645 = dma.vmem_to_hbm [thread:$0]  %s1643_s30, 16, %s2963_s10, [#allocation6]  }
 0x61c   :  { %2503 = dma.done.wait [#allocation6], 16  }
 0x61d   :  { %2504 = vsyncadd [#allocation6], 4294967280 }
 0x61e   :  { %1649 = vsyncpa [#allocation5], 1 }
 0x61f   :  { %1650 = vsyncpa [#allocation8], 1 }
 0x620   :  { %1651 = vsyncpa [#allocation6], 1 }

</bundles_post_ra>
